<compile_context>
chip_gen: v5e
topology: v5e:2x2
jax: 0.10.0
libtpu: 0.0.40
codegen_flags: <defaults>
</compile_context>

<pallas_src>
import functools

import jax
import jax.numpy as jnp
from jax import lax
from jax.experimental import pallas as pl
from jax.experimental.pallas import tpu as pltpu


def _set2set_kernel(x_ref, batch_ref, wq_ref, wr_ref, wh_ref, b_ref, out_ref,
                    *, processing_steps: int):
    f32 = jnp.float32
    x = x_ref[...]                      # [N, D]  matmul dtype (f32 or bf16)
    batch_row = batch_ref[...]          # [1, N]  int32 graph ids
    n, d = x.shape
    bsz = out_ref.shape[0]

    # Loop-invariant loads (weights kept f32 for the LSTM gate matmuls).
    wq = wq_ref[...]                    # [4, D, D]  gate k: q @ wq[k]
    wr = wr_ref[...]                    # [4, D, D]  gate k: r @ wr[k]
    wh = wh_ref[...]                    # [4, D, D]  gate k: h @ wh[k]
    bias = b_ref[...]                   # [4, 1, D]  b_ih + b_hh per gate

    # Graph-membership mask built in-kernel: [B, N], N on lanes (lane-dense).
    graph_iota = lax.broadcasted_iota(jnp.int32, (bsz, n), 0)
    mask = graph_iota == batch_row      # [B, N] bool

    neg_inf = f32(-jnp.inf)

    def lstm_gate(k, q, r, h):
        return (jnp.dot(q, wq[k], preferred_element_type=f32)
                + jnp.dot(r, wr[k], preferred_element_type=f32)
                + jnp.dot(h, wh[k], preferred_element_type=f32)
                + bias[k])

    def step(carry):
        h, c, q, r = carry
        # ---- single-timestep LSTM on q_star = (q ‖ r); gate order i, f, g, o
        i_g = jax.nn.sigmoid(lstm_gate(0, q, r, h))
        f_g = jax.nn.sigmoid(lstm_gate(1, q, r, h))
        g_g = jnp.tanh(lstm_gate(2, q, r, h))
        o_g = jax.nn.sigmoid(lstm_gate(3, q, r, h))
        c = f_g * c + i_g * g_g
        h = o_g * jnp.tanh(c)
        q = h                                                   # [B, D] f32

        # ---- attention scores: contraction over D, lane-dense [B, N] output
        s = lax.dot_general(q.astype(x.dtype), x,
                            (((1,), (1,)), ((), ())),
                            preferred_element_type=f32)         # [B, N]

        # ---- per-graph softmax entirely in the [B, N] layout
        s_masked = jnp.where(mask, s, neg_inf)
        seg_max = jnp.max(s_masked, axis=1, keepdims=True)      # [B, 1]
        safe_max = jnp.where(seg_max == neg_inf, f32(0.0), seg_max)
        p = jnp.where(mask, jnp.exp(s - safe_max), f32(0.0))    # [B, N] f32
        seg_sum = jnp.sum(p, axis=1, keepdims=True)             # [B, 1]

        # ---- weighted readout: contraction over N (p @ x), divide on [B, D]
        r_un = lax.dot_general(p.astype(x.dtype), x,
                               (((1,), (0,)), ((), ())),
                               preferred_element_type=f32)      # [B, D]
        inv = 1.0 / jnp.where(seg_sum > 0.0, seg_sum, f32(1.0))  # empty-graph safe
        r = r_un * inv
        return h, c, q, r

    zeros = jnp.zeros((bsz, d), f32)
    carry = (zeros, zeros, zeros, zeros)
    if processing_steps <= 8:
        # Small fixed T: trace-time unroll gives the scheduler full visibility.
        for _ in range(processing_steps):
            carry = step(carry)
    else:
        # Large T: bounded live ranges / constant code size.
        carry = lax.fori_loop(0, processing_steps,
                              lambda _, cs: step(cs), carry)

    _, _, q, r = carry
    out_ref[...] = jnp.concatenate([q, r], axis=-1)             # [B, 2D]


def set2set(x, batch, w_ih, w_hh, b_ih, b_hh, *, batch_size, processing_steps,
            matmul_dtype=jnp.float32):
    """x: [N, D] float, batch: [N] int32 graph ids in [0, batch_size)."""
    n, d = x.shape
    x_in = jnp.asarray(x, matmul_dtype)                          # [N, D]
    batch_row = jnp.asarray(batch, jnp.int32).reshape(1, n)      # [1, N]

    # Split / pre-transpose LSTM weights into per-gate [D_in, D_out] blocks.
    w_ih4 = jnp.asarray(w_ih, jnp.float32).reshape(4, d, 2 * d)  # [4, Dout, 2D]
    w_q_t = jnp.transpose(w_ih4[:, :, :d], (0, 2, 1))            # [4, D, D]
    w_r_t = jnp.transpose(w_ih4[:, :, d:], (0, 2, 1))            # [4, D, D]
    w_h_t = jnp.transpose(jnp.asarray(w_hh, jnp.float32).reshape(4, d, d),
                          (0, 2, 1))                             # [4, D, D]
    bias = (jnp.asarray(b_ih, jnp.float32)
            + jnp.asarray(b_hh, jnp.float32)).reshape(4, 1, d)   # [4, 1, D]

    kernel = functools.partial(_set2set_kernel,
                               processing_steps=processing_steps)
    vmem = pl.BlockSpec(memory_space=pltpu.MemorySpace.VMEM)

    t = processing_steps
    flops = t * (4 * n * d * batch_size            # score + readout matmuls
                 + 24 * batch_size * d * d)        # 12 gate matmuls
    transcendentals = t * (batch_size * n + 5 * batch_size * d)
    bytes_accessed = int(x_in.size * x_in.dtype.itemsize
                         + batch_row.size * 4
                         + 3 * 4 * d * d * 4 + 4 * d * 4
                         + batch_size * 2 * d * 4)

    return pl.pallas_call(
        kernel,
        out_shape=jax.ShapeDtypeStruct((batch_size, 2 * d), jnp.float32),
        in_specs=[vmem] * 6,
        out_specs=vmem,
        compiler_params=pltpu.CompilerParams(
            vmem_limit_bytes=64 * 1024 * 1024),
        cost_estimate=pl.CostEstimate(flops=int(flops),
                                      transcendentals=int(transcendentals),
                                      bytes_accessed=bytes_accessed),
    )(x_in, batch_row, w_q_t, w_r_t, w_h_t, bias)


def set2set_ref(x, batch, w_ih, w_hh, b_ih, b_hh, *, batch_size,
                processing_steps):
    """Pure-JAX reference mirroring the PyTorch forward."""
    n, d = x.shape
    h = jnp.zeros((batch_size, d), jnp.float32)
    c = jnp.zeros((batch_size, d), jnp.float32)
    q_star = jnp.zeros((batch_size, 2 * d), jnp.float32)
    for _ in range(processing_steps):
        gates = q_star @ w_ih.T + b_ih + h @ w_hh.T + b_hh
        i_g = jax.nn.sigmoid(gates[:, 0 * d:1 * d])
        f_g = jax.nn.sigmoid(gates[:, 1 * d:2 * d])
        g_g = jnp.tanh(gates[:, 2 * d:3 * d])
        o_g = jax.nn.sigmoid(gates[:, 3 * d:4 * d])
        c = f_g * c + i_g * g_g
        h = o_g * jnp.tanh(c)
        q = h
        e = jnp.sum(x * q[batch], axis=-1)                      # [N]
        seg_max = jax.ops.segment_max(e, batch, batch_size)
        exp_e = jnp.exp(e - seg_max[batch])
        seg_sum = jax.ops.segment_sum(exp_e, batch, batch_size)
        a = (exp_e / seg_sum[batch])[:, None]
        r = jax.ops.segment_sum(a * x, batch, batch_size)
        q_star = jnp.concatenate([q, r], axis=-1)
    return q_star


if __name__ == "__main__":
    # Small deterministic setup consistent with Set2Set(in_channels=32, T=3)
    D = 32                 # in_channels
    T = 3                  # processing_steps
    N = 16                 # total number of nodes
    B = 2                  # number of graphs (batch_size)

    key = jax.random.PRNGKey(0)
    kx, k1, k2, k3, k4 = jax.random.split(key, 5)

    x = jax.random.normal(kx, (N, D), dtype=jnp.float32)
    batch = jnp.array([0] * 9 + [1] * 7, dtype=jnp.int32)       # [N]

    # nn.LSTM(2D -> D, num_layers=1) params, PyTorch init U(-1/sqrt(D), 1/sqrt(D))
    bound = 1.0 / jnp.sqrt(jnp.float32(D))
    w_ih = jax.random.uniform(k1, (4 * D, 2 * D), jnp.float32, -bound, bound)
    w_hh = jax.random.uniform(k2, (4 * D, D), jnp.float32, -bound, bound)
    b_ih = jax.random.uniform(k3, (4 * D,), jnp.float32, -bound, bound)
    b_hh = jax.random.uniform(k4, (4 * D,), jnp.float32, -bound, bound)

    ref = set2set_ref(x, batch, w_ih, w_hh, b_ih, b_hh,
                      batch_size=B, processing_steps=T)

    # f32 MXU-input path: exact-tolerance check against the reference.
    out = set2set(x, batch, w_ih, w_hh, b_ih, b_hh,
                  batch_size=B, processing_steps=T,
                  matmul_dtype=jnp.float32)
    out = jax.block_until_ready(out)
    assert out.shape == (B, 2 * D)
    assert jnp.allclose(out, ref, atol=1e-4, rtol=1e-4), (
        f"max abs err {jnp.max(jnp.abs(out - ref))}")

    # bf16 MXU-input path (recommended on v6e/v7x for large N): looser check.
    out_bf16 = set2set(x, batch, w_ih, w_hh, b_ih, b_hh,
                       batch_size=B, processing_steps=T,
                       matmul_dtype=jnp.bfloat16)
    out_bf16 = jax.block_until_ready(out_bf16)
    assert out_bf16.shape == (B, 2 * D)
    assert bool(jnp.all(jnp.isfinite(out_bf16)))
    assert float(jnp.max(jnp.abs(out_bf16 - ref))) < 0.2, (
        f"bf16 max abs err {jnp.max(jnp.abs(out_bf16 - ref))}")

    print("KERNEL_OK")
</pallas_src>

<mosaic_0001>
module attributes {stable_mosaic.version = 11 : i64} {
  func.func @_set2set_kernel(%arg0: memref<16x32xf32, #tpu.memory_space<vmem>>, %arg1: memref<1x16xi32, #tpu.memory_space<vmem>>, %arg2: memref<4x32x32xf32, #tpu.memory_space<vmem>>, %arg3: memref<4x32x32xf32, #tpu.memory_space<vmem>>, %arg4: memref<4x32x32xf32, #tpu.memory_space<vmem>>, %arg5: memref<4x1x32xf32, #tpu.memory_space<vmem>>, %arg6: memref<2x64xf32, #tpu.memory_space<vmem>>) attributes {dimension_semantics = [], scalar_prefetch = 0 : i64, scratch_operands = 0 : i64, tpu.core_type = #tpu.core_type<tc>} {
    %c0 = arith.constant 0 : index
    %c0_0 = arith.constant 0 : index
    %0 = vector.load %arg0[%c0, %c0_0] : memref<16x32xf32, #tpu.memory_space<vmem>>, vector<16x32xf32>
    %c0_1 = arith.constant 0 : index
    %c0_2 = arith.constant 0 : index
    %1 = vector.load %arg1[%c0_1, %c0_2] : memref<1x16xi32, #tpu.memory_space<vmem>>, vector<1x16xi32>
    %c0_3 = arith.constant 0 : index
    %c0_4 = arith.constant 0 : index
    %c0_5 = arith.constant 0 : index
    %2 = vector.load %arg2[%c0_3, %c0_4, %c0_5] : memref<4x32x32xf32, #tpu.memory_space<vmem>>, vector<4x32x32xf32>
    %c0_6 = arith.constant 0 : index
    %c0_7 = arith.constant 0 : index
    %c0_8 = arith.constant 0 : index
    %3 = vector.load %arg3[%c0_6, %c0_7, %c0_8] : memref<4x32x32xf32, #tpu.memory_space<vmem>>, vector<4x32x32xf32>
    %c0_9 = arith.constant 0 : index
    %c0_10 = arith.constant 0 : index
    %c0_11 = arith.constant 0 : index
    %4 = vector.load %arg4[%c0_9, %c0_10, %c0_11] : memref<4x32x32xf32, #tpu.memory_space<vmem>>, vector<4x32x32xf32>
    %c0_12 = arith.constant 0 : index
    %c0_13 = arith.constant 0 : index
    %c0_14 = arith.constant 0 : index
    %5 = vector.load %arg5[%c0_12, %c0_13, %c0_14] : memref<4x1x32xf32, #tpu.memory_space<vmem>>, vector<4x1x32xf32>
    %6 = tpu.iota {dimensions = array<i32: 0>} : vector<2x16xi32>
    %7 = vector.broadcast %1 : vector<1x16xi32> to vector<2x16xi32>
    %8 = arith.cmpi eq, %6, %7 : vector<2x16xi32>
    %cst = arith.constant 0.000000e+00 : f32
    %9 = vector.broadcast %cst : f32 to vector<2x32xf32>
    %10 = vector.extract_strided_slice %2 {offsets = [0, 0, 0], sizes = [1, 32, 32], strides = [1, 1, 1]} : vector<4x32x32xf32> to vector<1x32x32xf32>
    %11 = vector.shape_cast %10 : vector<1x32x32xf32> to vector<32x32xf32>
    %cst_15 = arith.constant dense<0.000000e+00> : vector<2x32xf32>
    %12 = tpu.matmul %9, %11, %cst_15 {dimension_numbers = #tpu.dot_dimension_numbers<[1], [0], [0], [1], [0, 0, 1, 1], [], []>} : vector<2x32xf32>, vector<32x32xf32>, vector<2x32xf32> -> vector<2x32xf32>
    %13 = vector.extract_strided_slice %3 {offsets = [0, 0, 0], sizes = [1, 32, 32], strides = [1, 1, 1]} : vector<4x32x32xf32> to vector<1x32x32xf32>
    %14 = vector.shape_cast %13 : vector<1x32x32xf32> to vector<32x32xf32>
    %cst_16 = arith.constant dense<0.000000e+00> : vector<2x32xf32>
    %15 = tpu.matmul %9, %14, %cst_16 {dimension_numbers = #tpu.dot_dimension_numbers<[1], [0], [0], [1], [0, 0, 1, 1], [], []>} : vector<2x32xf32>, vector<32x32xf32>, vector<2x32xf32> -> vector<2x32xf32>
    %16 = arith.addf %12, %15 : vector<2x32xf32>
    %17 = vector.extract_strided_slice %4 {offsets = [0, 0, 0], sizes = [1, 32, 32], strides = [1, 1, 1]} : vector<4x32x32xf32> to vector<1x32x32xf32>
    %18 = vector.shape_cast %17 : vector<1x32x32xf32> to vector<32x32xf32>
    %cst_17 = arith.constant dense<0.000000e+00> : vector<2x32xf32>
    %19 = tpu.matmul %9, %18, %cst_17 {dimension_numbers = #tpu.dot_dimension_numbers<[1], [0], [0], [1], [0, 0, 1, 1], [], []>} : vector<2x32xf32>, vector<32x32xf32>, vector<2x32xf32> -> vector<2x32xf32>
    %20 = arith.addf %16, %19 : vector<2x32xf32>
    %21 = vector.extract_strided_slice %5 {offsets = [0, 0, 0], sizes = [1, 1, 32], strides = [1, 1, 1]} : vector<4x1x32xf32> to vector<1x1x32xf32>
    %22 = vector.shape_cast %21 : vector<1x1x32xf32> to vector<1x32xf32>
    %23 = vector.broadcast %22 : vector<1x32xf32> to vector<2x32xf32>
    %24 = arith.addf %20, %23 : vector<2x32xf32>
    %25 = arith.negf %24 : vector<2x32xf32>
    %26 = math.exp %25 : vector<2x32xf32>
    %cst_18 = arith.constant 1.000000e+00 : f32
    %27 = vector.broadcast %cst_18 : f32 to vector<2x32xf32>
    %28 = arith.addf %27, %26 : vector<2x32xf32>
    %29 = arith.divf %27, %28 : vector<2x32xf32>
    %30 = vector.extract_strided_slice %2 {offsets = [1, 0, 0], sizes = [1, 32, 32], strides = [1, 1, 1]} : vector<4x32x32xf32> to vector<1x32x32xf32>
    %31 = vector.shape_cast %30 : vector<1x32x32xf32> to vector<32x32xf32>
    %cst_19 = arith.constant dense<0.000000e+00> : vector<2x32xf32>
    %32 = tpu.matmul %9, %31, %cst_19 {dimension_numbers = #tpu.dot_dimension_numbers<[1], [0], [0], [1], [0, 0, 1, 1], [], []>} : vector<2x32xf32>, vector<32x32xf32>, vector<2x32xf32> -> vector<2x32xf32>
    %33 = vector.extract_strided_slice %3 {offsets = [1, 0, 0], sizes = [1, 32, 32], strides = [1, 1, 1]} : vector<4x32x32xf32> to vector<1x32x32xf32>
    %34 = vector.shape_cast %33 : vector<1x32x32xf32> to vector<32x32xf32>
    %cst_20 = arith.constant dense<0.000000e+00> : vector<2x32xf32>
    %35 = tpu.matmul %9, %34, %cst_20 {dimension_numbers = #tpu.dot_dimension_numbers<[1], [0], [0], [1], [0, 0, 1, 1], [], []>} : vector<2x32xf32>, vector<32x32xf32>, vector<2x32xf32> -> vector<2x32xf32>
    %36 = arith.addf %32, %35 : vector<2x32xf32>
    %37 = vector.extract_strided_slice %4 {offsets = [1, 0, 0], sizes = [1, 32, 32], strides = [1, 1, 1]} : vector<4x32x32xf32> to vector<1x32x32xf32>
    %38 = vector.shape_cast %37 : vector<1x32x32xf32> to vector<32x32xf32>
    %cst_21 = arith.constant dense<0.000000e+00> : vector<2x32xf32>
    %39 = tpu.matmul %9, %38, %cst_21 {dimension_numbers = #tpu.dot_dimension_numbers<[1], [0], [0], [1], [0, 0, 1, 1], [], []>} : vector<2x32xf32>, vector<32x32xf32>, vector<2x32xf32> -> vector<2x32xf32>
    %40 = arith.addf %36, %39 : vector<2x32xf32>
    %41 = vector.extract_strided_slice %5 {offsets = [1, 0, 0], sizes = [1, 1, 32], strides = [1, 1, 1]} : vector<4x1x32xf32> to vector<1x1x32xf32>
    %42 = vector.shape_cast %41 : vector<1x1x32xf32> to vector<1x32xf32>
    %43 = vector.broadcast %42 : vector<1x32xf32> to vector<2x32xf32>
    %44 = arith.addf %40, %43 : vector<2x32xf32>
    %45 = arith.negf %44 : vector<2x32xf32>
    %46 = math.exp %45 : vector<2x32xf32>
    %cst_22 = arith.constant 1.000000e+00 : f32
    %47 = vector.broadcast %cst_22 : f32 to vector<2x32xf32>
    %48 = arith.addf %47, %46 : vector<2x32xf32>
    %49 = arith.divf %47, %48 : vector<2x32xf32>
    %50 = vector.extract_strided_slice %2 {offsets = [2, 0, 0], sizes = [1, 32, 32], strides = [1, 1, 1]} : vector<4x32x32xf32> to vector<1x32x32xf32>
    %51 = vector.shape_cast %50 : vector<1x32x32xf32> to vector<32x32xf32>
    %cst_23 = arith.constant dense<0.000000e+00> : vector<2x32xf32>
    %52 = tpu.matmul %9, %51, %cst_23 {dimension_numbers = #tpu.dot_dimension_numbers<[1], [0], [0], [1], [0, 0, 1, 1], [], []>} : vector<2x32xf32>, vector<32x32xf32>, vector<2x32xf32> -> vector<2x32xf32>
    %53 = vector.extract_strided_slice %3 {offsets = [2, 0, 0], sizes = [1, 32, 32], strides = [1, 1, 1]} : vector<4x32x32xf32> to vector<1x32x32xf32>
    %54 = vector.shape_cast %53 : vector<1x32x32xf32> to vector<32x32xf32>
    %cst_24 = arith.constant dense<0.000000e+00> : vector<2x32xf32>
    %55 = tpu.matmul %9, %54, %cst_24 {dimension_numbers = #tpu.dot_dimension_numbers<[1], [0], [0], [1], [0, 0, 1, 1], [], []>} : vector<2x32xf32>, vector<32x32xf32>, vector<2x32xf32> -> vector<2x32xf32>
    %56 = arith.addf %52, %55 : vector<2x32xf32>
    %57 = vector.extract_strided_slice %4 {offsets = [2, 0, 0], sizes = [1, 32, 32], strides = [1, 1, 1]} : vector<4x32x32xf32> to vector<1x32x32xf32>
    %58 = vector.shape_cast %57 : vector<1x32x32xf32> to vector<32x32xf32>
    %cst_25 = arith.constant dense<0.000000e+00> : vector<2x32xf32>
    %59 = tpu.matmul %9, %58, %cst_25 {dimension_numbers = #tpu.dot_dimension_numbers<[1], [0], [0], [1], [0, 0, 1, 1], [], []>} : vector<2x32xf32>, vector<32x32xf32>, vector<2x32xf32> -> vector<2x32xf32>
    %60 = arith.addf %56, %59 : vector<2x32xf32>
    %61 = vector.extract_strided_slice %5 {offsets = [2, 0, 0], sizes = [1, 1, 32], strides = [1, 1, 1]} : vector<4x1x32xf32> to vector<1x1x32xf32>
    %62 = vector.shape_cast %61 : vector<1x1x32xf32> to vector<1x32xf32>
    %63 = vector.broadcast %62 : vector<1x32xf32> to vector<2x32xf32>
    %64 = arith.addf %60, %63 : vector<2x32xf32>
    %65 = math.tanh %64 : vector<2x32xf32>
    %66 = vector.extract_strided_slice %2 {offsets = [3, 0, 0], sizes = [1, 32, 32], strides = [1, 1, 1]} : vector<4x32x32xf32> to vector<1x32x32xf32>
    %67 = vector.shape_cast %66 : vector<1x32x32xf32> to vector<32x32xf32>
    %cst_26 = arith.constant dense<0.000000e+00> : vector<2x32xf32>
    %68 = tpu.matmul %9, %67, %cst_26 {dimension_numbers = #tpu.dot_dimension_numbers<[1], [0], [0], [1], [0, 0, 1, 1], [], []>} : vector<2x32xf32>, vector<32x32xf32>, vector<2x32xf32> -> vector<2x32xf32>
    %69 = vector.extract_strided_slice %3 {offsets = [3, 0, 0], sizes = [1, 32, 32], strides = [1, 1, 1]} : vector<4x32x32xf32> to vector<1x32x32xf32>
    %70 = vector.shape_cast %69 : vector<1x32x32xf32> to vector<32x32xf32>
    %cst_27 = arith.constant dense<0.000000e+00> : vector<2x32xf32>
    %71 = tpu.matmul %9, %70, %cst_27 {dimension_numbers = #tpu.dot_dimension_numbers<[1], [0], [0], [1], [0, 0, 1, 1], [], []>} : vector<2x32xf32>, vector<32x32xf32>, vector<2x32xf32> -> vector<2x32xf32>
    %72 = arith.addf %68, %71 : vector<2x32xf32>
    %73 = vector.extract_strided_slice %4 {offsets = [3, 0, 0], sizes = [1, 32, 32], strides = [1, 1, 1]} : vector<4x32x32xf32> to vector<1x32x32xf32>
    %74 = vector.shape_cast %73 : vector<1x32x32xf32> to vector<32x32xf32>
    %cst_28 = arith.constant dense<0.000000e+00> : vector<2x32xf32>
    %75 = tpu.matmul %9, %74, %cst_28 {dimension_numbers = #tpu.dot_dimension_numbers<[1], [0], [0], [1], [0, 0, 1, 1], [], []>} : vector<2x32xf32>, vector<32x32xf32>, vector<2x32xf32> -> vector<2x32xf32>
    %76 = arith.addf %72, %75 : vector<2x32xf32>
    %77 = vector.extract_strided_slice %5 {offsets = [3, 0, 0], sizes = [1, 1, 32], strides = [1, 1, 1]} : vector<4x1x32xf32> to vector<1x1x32xf32>
    %78 = vector.shape_cast %77 : vector<1x1x32xf32> to vector<1x32xf32>
    %79 = vector.broadcast %78 : vector<1x32xf32> to vector<2x32xf32>
    %80 = arith.addf %76, %79 : vector<2x32xf32>
    %81 = arith.negf %80 : vector<2x32xf32>
    %82 = math.exp %81 : vector<2x32xf32>
    %cst_29 = arith.constant 1.000000e+00 : f32
    %83 = vector.broadcast %cst_29 : f32 to vector<2x32xf32>
    %84 = arith.addf %83, %82 : vector<2x32xf32>
    %85 = arith.divf %83, %84 : vector<2x32xf32>
    %86 = arith.mulf %49, %9 : vector<2x32xf32>
    %87 = arith.mulf %29, %65 : vector<2x32xf32>
    %88 = arith.addf %86, %87 : vector<2x32xf32>
    %89 = math.tanh %88 : vector<2x32xf32>
    %90 = arith.mulf %85, %89 : vector<2x32xf32>
    %cst_30 = arith.constant dense<0.000000e+00> : vector<2x16xf32>
    %91 = tpu.matmul %90, %0, %cst_30 {dimension_numbers = #tpu.dot_dimension_numbers<[1], [1], [0], [0], [0, 0, 1, 0], [], []>} : vector<2x32xf32>, vector<16x32xf32>, vector<2x16xf32> -> vector<2x16xf32>
    %cst_31 = arith.constant 0xFF800000 : f32
    %92 = vector.broadcast %cst_31 : f32 to vector<2x16xf32>
    %93 = arith.select %8, %91, %92 : vector<2x16xi1>, vector<2x16xf32>
    %cst_32 = arith.constant dense<0xFF800000> : vector<2xf32>
    %94 = vector.multi_reduction <maximumf>, %93, %cst_32 [1] : vector<2x16xf32> to vector<2xf32>
    %95 = vector.shape_cast %94 : vector<2xf32> to vector<2x1xf32>
    %cst_33 = arith.constant 0xFF800000 : f32
    %96 = vector.broadcast %cst_33 : f32 to vector<2x1xf32>
    %97 = arith.cmpf oeq, %95, %96 : vector<2x1xf32>
    %cst_34 = arith.constant 0.000000e+00 : f32
    %98 = vector.broadcast %cst_34 : f32 to vector<2x1xf32>
    %99 = arith.select %97, %98, %95 : vector<2x1xi1>, vector<2x1xf32>
    %100 = vector.broadcast %99 : vector<2x1xf32> to vector<2x16xf32>
    %101 = arith.subf %91, %100 : vector<2x16xf32>
    %102 = math.exp %101 : vector<2x16xf32>
    %cst_35 = arith.constant 0.000000e+00 : f32
    %103 = vector.broadcast %cst_35 : f32 to vector<2x16xf32>
    %104 = arith.select %8, %102, %103 : vector<2x16xi1>, vector<2x16xf32>
    %cst_36 = arith.constant dense<0.000000e+00> : vector<2xf32>
    %105 = vector.multi_reduction <add>, %104, %cst_36 [1] : vector<2x16xf32> to vector<2xf32>
    %106 = vector.shape_cast %105 : vector<2xf32> to vector<2x1xf32>
    %cst_37 = arith.constant dense<0.000000e+00> : vector<2x32xf32>
    %107 = tpu.matmul %104, %0, %cst_37 {dimension_numbers = #tpu.dot_dimension_numbers<[1], [0], [0], [1], [0, 0, 1, 1], [], []>} : vector<2x16xf32>, vector<16x32xf32>, vector<2x32xf32> -> vector<2x32xf32>
    %cst_38 = arith.constant 0.000000e+00 : f32
    %108 = vector.broadcast %cst_38 : f32 to vector<2x1xf32>
    %109 = arith.cmpf ogt, %106, %108 : vector<2x1xf32>
    %cst_39 = arith.constant 1.000000e+00 : f32
    %110 = vector.broadcast %cst_39 : f32 to vector<2x1xf32>
    %111 = arith.select %109, %106, %110 : vector<2x1xi1>, vector<2x1xf32>
    %cst_40 = arith.constant 1.000000e+00 : f32
    %112 = vector.broadcast %cst_40 : f32 to vector<2x1xf32>
    %113 = arith.divf %112, %111 : vector<2x1xf32>
    %114 = vector.broadcast %113 : vector<2x1xf32> to vector<2x32xf32>
    %115 = arith.mulf %107, %114 : vector<2x32xf32>
    %116 = vector.extract_strided_slice %2 {offsets = [0, 0, 0], sizes = [1, 32, 32], strides = [1, 1, 1]} : vector<4x32x32xf32> to vector<1x32x32xf32>
    %117 = vector.shape_cast %116 : vector<1x32x32xf32> to vector<32x32xf32>
    %cst_41 = arith.constant dense<0.000000e+00> : vector<2x32xf32>
    %118 = tpu.matmul %90, %117, %cst_41 {dimension_numbers = #tpu.dot_dimension_numbers<[1], [0], [0], [1], [0, 0, 1, 1], [], []>} : vector<2x32xf32>, vector<32x32xf32>, vector<2x32xf32> -> vector<2x32xf32>
    %119 = vector.extract_strided_slice %3 {offsets = [0, 0, 0], sizes = [1, 32, 32], strides = [1, 1, 1]} : vector<4x32x32xf32> to vector<1x32x32xf32>
    %120 = vector.shape_cast %119 : vector<1x32x32xf32> to vector<32x32xf32>
    %cst_42 = arith.constant dense<0.000000e+00> : vector<2x32xf32>
    %121 = tpu.matmul %115, %120, %cst_42 {dimension_numbers = #tpu.dot_dimension_numbers<[1], [0], [0], [1], [0, 0, 1, 1], [], []>} : vector<2x32xf32>, vector<32x32xf32>, vector<2x32xf32> -> vector<2x32xf32>
    %122 = arith.addf %118, %121 : vector<2x32xf32>
    %123 = vector.extract_strided_slice %4 {offsets = [0, 0, 0], sizes = [1, 32, 32], strides = [1, 1, 1]} : vector<4x32x32xf32> to vector<1x32x32xf32>
    %124 = vector.shape_cast %123 : vector<1x32x32xf32> to vector<32x32xf32>
    %cst_43 = arith.constant dense<0.000000e+00> : vector<2x32xf32>
    %125 = tpu.matmul %90, %124, %cst_43 {dimension_numbers = #tpu.dot_dimension_numbers<[1], [0], [0], [1], [0, 0, 1, 1], [], []>} : vector<2x32xf32>, vector<32x32xf32>, vector<2x32xf32> -> vector<2x32xf32>
    %126 = arith.addf %122, %125 : vector<2x32xf32>
    %127 = vector.extract_strided_slice %5 {offsets = [0, 0, 0], sizes = [1, 1, 32], strides = [1, 1, 1]} : vector<4x1x32xf32> to vector<1x1x32xf32>
    %128 = vector.shape_cast %127 : vector<1x1x32xf32> to vector<1x32xf32>
    %129 = vector.broadcast %128 : vector<1x32xf32> to vector<2x32xf32>
    %130 = arith.addf %126, %129 : vector<2x32xf32>
    %131 = arith.negf %130 : vector<2x32xf32>
    %132 = math.exp %131 : vector<2x32xf32>
    %cst_44 = arith.constant 1.000000e+00 : f32
    %133 = vector.broadcast %cst_44 : f32 to vector<2x32xf32>
    %134 = arith.addf %133, %132 : vector<2x32xf32>
    %135 = arith.divf %133, %134 : vector<2x32xf32>
    %136 = vector.extract_strided_slice %2 {offsets = [1, 0, 0], sizes = [1, 32, 32], strides = [1, 1, 1]} : vector<4x32x32xf32> to vector<1x32x32xf32>
    %137 = vector.shape_cast %136 : vector<1x32x32xf32> to vector<32x32xf32>
    %cst_45 = arith.constant dense<0.000000e+00> : vector<2x32xf32>
    %138 = tpu.matmul %90, %137, %cst_45 {dimension_numbers = #tpu.dot_dimension_numbers<[1], [0], [0], [1], [0, 0, 1, 1], [], []>} : vector<2x32xf32>, vector<32x32xf32>, vector<2x32xf32> -> vector<2x32xf32>
    %139 = vector.extract_strided_slice %3 {offsets = [1, 0, 0], sizes = [1, 32, 32], strides = [1, 1, 1]} : vector<4x32x32xf32> to vector<1x32x32xf32>
    %140 = vector.shape_cast %139 : vector<1x32x32xf32> to vector<32x32xf32>
    %cst_46 = arith.constant dense<0.000000e+00> : vector<2x32xf32>
    %141 = tpu.matmul %115, %140, %cst_46 {dimension_numbers = #tpu.dot_dimension_numbers<[1], [0], [0], [1], [0, 0, 1, 1], [], []>} : vector<2x32xf32>, vector<32x32xf32>, vector<2x32xf32> -> vector<2x32xf32>
    %142 = arith.addf %138, %141 : vector<2x32xf32>
    %143 = vector.extract_strided_slice %4 {offsets = [1, 0, 0], sizes = [1, 32, 32], strides = [1, 1, 1]} : vector<4x32x32xf32> to vector<1x32x32xf32>
    %144 = vector.shape_cast %143 : vector<1x32x32xf32> to vector<32x32xf32>
    %cst_47 = arith.constant dense<0.000000e+00> : vector<2x32xf32>
    %145 = tpu.matmul %90, %144, %cst_47 {dimension_numbers = #tpu.dot_dimension_numbers<[1], [0], [0], [1], [0, 0, 1, 1], [], []>} : vector<2x32xf32>, vector<32x32xf32>, vector<2x32xf32> -> vector<2x32xf32>
    %146 = arith.addf %142, %145 : vector<2x32xf32>
    %147 = vector.extract_strided_slice %5 {offsets = [1, 0, 0], sizes = [1, 1, 32], strides = [1, 1, 1]} : vector<4x1x32xf32> to vector<1x1x32xf32>
    %148 = vector.shape_cast %147 : vector<1x1x32xf32> to vector<1x32xf32>
    %149 = vector.broadcast %148 : vector<1x32xf32> to vector<2x32xf32>
    %150 = arith.addf %146, %149 : vector<2x32xf32>
    %151 = arith.negf %150 : vector<2x32xf32>
    %152 = math.exp %151 : vector<2x32xf32>
    %cst_48 = arith.constant 1.000000e+00 : f32
    %153 = vector.broadcast %cst_48 : f32 to vector<2x32xf32>
    %154 = arith.addf %153, %152 : vector<2x32xf32>
    %155 = arith.divf %153, %154 : vector<2x32xf32>
    %156 = vector.extract_strided_slice %2 {offsets = [2, 0, 0], sizes = [1, 32, 32], strides = [1, 1, 1]} : vector<4x32x32xf32> to vector<1x32x32xf32>
    %157 = vector.shape_cast %156 : vector<1x32x32xf32> to vector<32x32xf32>
    %cst_49 = arith.constant dense<0.000000e+00> : vector<2x32xf32>
    %158 = tpu.matmul %90, %157, %cst_49 {dimension_numbers = #tpu.dot_dimension_numbers<[1], [0], [0], [1], [0, 0, 1, 1], [], []>} : vector<2x32xf32>, vector<32x32xf32>, vector<2x32xf32> -> vector<2x32xf32>
    %159 = vector.extract_strided_slice %3 {offsets = [2, 0, 0], sizes = [1, 32, 32], strides = [1, 1, 1]} : vector<4x32x32xf32> to vector<1x32x32xf32>
    %160 = vector.shape_cast %159 : vector<1x32x32xf32> to vector<32x32xf32>
    %cst_50 = arith.constant dense<0.000000e+00> : vector<2x32xf32>
    %161 = tpu.matmul %115, %160, %cst_50 {dimension_numbers = #tpu.dot_dimension_numbers<[1], [0], [0], [1], [0, 0, 1, 1], [], []>} : vector<2x32xf32>, vector<32x32xf32>, vector<2x32xf32> -> vector<2x32xf32>
    %162 = arith.addf %158, %161 : vector<2x32xf32>
    %163 = vector.extract_strided_slice %4 {offsets = [2, 0, 0], sizes = [1, 32, 32], strides = [1, 1, 1]} : vector<4x32x32xf32> to vector<1x32x32xf32>
    %164 = vector.shape_cast %163 : vector<1x32x32xf32> to vector<32x32xf32>
    %cst_51 = arith.constant dense<0.000000e+00> : vector<2x32xf32>
    %165 = tpu.matmul %90, %164, %cst_51 {dimension_numbers = #tpu.dot_dimension_numbers<[1], [0], [0], [1], [0, 0, 1, 1], [], []>} : vector<2x32xf32>, vector<32x32xf32>, vector<2x32xf32> -> vector<2x32xf32>
    %166 = arith.addf %162, %165 : vector<2x32xf32>
    %167 = vector.extract_strided_slice %5 {offsets = [2, 0, 0], sizes = [1, 1, 32], strides = [1, 1, 1]} : vector<4x1x32xf32> to vector<1x1x32xf32>
    %168 = vector.shape_cast %167 : vector<1x1x32xf32> to vector<1x32xf32>
    %169 = vector.broadcast %168 : vector<1x32xf32> to vector<2x32xf32>
    %170 = arith.addf %166, %169 : vector<2x32xf32>
    %171 = math.tanh %170 : vector<2x32xf32>
    %172 = vector.extract_strided_slice %2 {offsets = [3, 0, 0], sizes = [1, 32, 32], strides = [1, 1, 1]} : vector<4x32x32xf32> to vector<1x32x32xf32>
    %173 = vector.shape_cast %172 : vector<1x32x32xf32> to vector<32x32xf32>
    %cst_52 = arith.constant dense<0.000000e+00> : vector<2x32xf32>
    %174 = tpu.matmul %90, %173, %cst_52 {dimension_numbers = #tpu.dot_dimension_numbers<[1], [0], [0], [1], [0, 0, 1, 1], [], []>} : vector<2x32xf32>, vector<32x32xf32>, vector<2x32xf32> -> vector<2x32xf32>
    %175 = vector.extract_strided_slice %3 {offsets = [3, 0, 0], sizes = [1, 32, 32], strides = [1, 1, 1]} : vector<4x32x32xf32> to vector<1x32x32xf32>
    %176 = vector.shape_cast %175 : vector<1x32x32xf32> to vector<32x32xf32>
    %cst_53 = arith.constant dense<0.000000e+00> : vector<2x32xf32>
    %177 = tpu.matmul %115, %176, %cst_53 {dimension_numbers = #tpu.dot_dimension_numbers<[1], [0], [0], [1], [0, 0, 1, 1], [], []>} : vector<2x32xf32>, vector<32x32xf32>, vector<2x32xf32> -> vector<2x32xf32>
    %178 = arith.addf %174, %177 : vector<2x32xf32>
    %179 = vector.extract_strided_slice %4 {offsets = [3, 0, 0], sizes = [1, 32, 32], strides = [1, 1, 1]} : vector<4x32x32xf32> to vector<1x32x32xf32>
    %180 = vector.shape_cast %179 : vector<1x32x32xf32> to vector<32x32xf32>
    %cst_54 = arith.constant dense<0.000000e+00> : vector<2x32xf32>
    %181 = tpu.matmul %90, %180, %cst_54 {dimension_numbers = #tpu.dot_dimension_numbers<[1], [0], [0], [1], [0, 0, 1, 1], [], []>} : vector<2x32xf32>, vector<32x32xf32>, vector<2x32xf32> -> vector<2x32xf32>
    %182 = arith.addf %178, %181 : vector<2x32xf32>
    %183 = vector.extract_strided_slice %5 {offsets = [3, 0, 0], sizes = [1, 1, 32], strides = [1, 1, 1]} : vector<4x1x32xf32> to vector<1x1x32xf32>
    %184 = vector.shape_cast %183 : vector<1x1x32xf32> to vector<1x32xf32>
    %185 = vector.broadcast %184 : vector<1x32xf32> to vector<2x32xf32>
    %186 = arith.addf %182, %185 : vector<2x32xf32>
    %187 = arith.negf %186 : vector<2x32xf32>
    %188 = math.exp %187 : vector<2x32xf32>
    %cst_55 = arith.constant 1.000000e+00 : f32
    %189 = vector.broadcast %cst_55 : f32 to vector<2x32xf32>
    %190 = arith.addf %189, %188 : vector<2x32xf32>
    %191 = arith.divf %189, %190 : vector<2x32xf32>
    %192 = arith.mulf %155, %88 : vector<2x32xf32>
    %193 = arith.mulf %135, %171 : vector<2x32xf32>
    %194 = arith.addf %192, %193 : vector<2x32xf32>
    %195 = math.tanh %194 : vector<2x32xf32>
    %196 = arith.mulf %191, %195 : vector<2x32xf32>
    %cst_56 = arith.constant dense<0.000000e+00> : vector<2x16xf32>
    %197 = tpu.matmul %196, %0, %cst_56 {dimension_numbers = #tpu.dot_dimension_numbers<[1], [1], [0], [0], [0, 0, 1, 0], [], []>} : vector<2x32xf32>, vector<16x32xf32>, vector<2x16xf32> -> vector<2x16xf32>
    %cst_57 = arith.constant 0xFF800000 : f32
    %198 = vector.broadcast %cst_57 : f32 to vector<2x16xf32>
    %199 = arith.select %8, %197, %198 : vector<2x16xi1>, vector<2x16xf32>
    %cst_58 = arith.constant dense<0xFF800000> : vector<2xf32>
    %200 = vector.multi_reduction <maximumf>, %199, %cst_58 [1] : vector<2x16xf32> to vector<2xf32>
    %201 = vector.shape_cast %200 : vector<2xf32> to vector<2x1xf32>
    %cst_59 = arith.constant 0xFF800000 : f32
    %202 = vector.broadcast %cst_59 : f32 to vector<2x1xf32>
    %203 = arith.cmpf oeq, %201, %202 : vector<2x1xf32>
    %cst_60 = arith.constant 0.000000e+00 : f32
    %204 = vector.broadcast %cst_60 : f32 to vector<2x1xf32>
    %205 = arith.select %203, %204, %201 : vector<2x1xi1>, vector<2x1xf32>
    %206 = vector.broadcast %205 : vector<2x1xf32> to vector<2x16xf32>
    %207 = arith.subf %197, %206 : vector<2x16xf32>
    %208 = math.exp %207 : vector<2x16xf32>
    %cst_61 = arith.constant 0.000000e+00 : f32
    %209 = vector.broadcast %cst_61 : f32 to vector<2x16xf32>
    %210 = arith.select %8, %208, %209 : vector<2x16xi1>, vector<2x16xf32>
    %cst_62 = arith.constant dense<0.000000e+00> : vector<2xf32>
    %211 = vector.multi_reduction <add>, %210, %cst_62 [1] : vector<2x16xf32> to vector<2xf32>
    %212 = vector.shape_cast %211 : vector<2xf32> to vector<2x1xf32>
    %cst_63 = arith.constant dense<0.000000e+00> : vector<2x32xf32>
    %213 = tpu.matmul %210, %0, %cst_63 {dimension_numbers = #tpu.dot_dimension_numbers<[1], [0], [0], [1], [0, 0, 1, 1], [], []>} : vector<2x16xf32>, vector<16x32xf32>, vector<2x32xf32> -> vector<2x32xf32>
    %cst_64 = arith.constant 0.000000e+00 : f32
    %214 = vector.broadcast %cst_64 : f32 to vector<2x1xf32>
    %215 = arith.cmpf ogt, %212, %214 : vector<2x1xf32>
    %cst_65 = arith.constant 1.000000e+00 : f32
    %216 = vector.broadcast %cst_65 : f32 to vector<2x1xf32>
    %217 = arith.select %215, %212, %216 : vector<2x1xi1>, vector<2x1xf32>
    %cst_66 = arith.constant 1.000000e+00 : f32
    %218 = vector.broadcast %cst_66 : f32 to vector<2x1xf32>
    %219 = arith.divf %218, %217 : vector<2x1xf32>
    %220 = vector.broadcast %219 : vector<2x1xf32> to vector<2x32xf32>
    %221 = arith.mulf %213, %220 : vector<2x32xf32>
    %222 = vector.extract_strided_slice %2 {offsets = [0, 0, 0], sizes = [1, 32, 32], strides = [1, 1, 1]} : vector<4x32x32xf32> to vector<1x32x32xf32>
    %223 = vector.shape_cast %222 : vector<1x32x32xf32> to vector<32x32xf32>
    %cst_67 = arith.constant dense<0.000000e+00> : vector<2x32xf32>
    %224 = tpu.matmul %196, %223, %cst_67 {dimension_numbers = #tpu.dot_dimension_numbers<[1], [0], [0], [1], [0, 0, 1, 1], [], []>} : vector<2x32xf32>, vector<32x32xf32>, vector<2x32xf32> -> vector<2x32xf32>
    %225 = vector.extract_strided_slice %3 {offsets = [0, 0, 0], sizes = [1, 32, 32], strides = [1, 1, 1]} : vector<4x32x32xf32> to vector<1x32x32xf32>
    %226 = vector.shape_cast %225 : vector<1x32x32xf32> to vector<32x32xf32>
    %cst_68 = arith.constant dense<0.000000e+00> : vector<2x32xf32>
    %227 = tpu.matmul %221, %226, %cst_68 {dimension_numbers = #tpu.dot_dimension_numbers<[1], [0], [0], [1], [0, 0, 1, 1], [], []>} : vector<2x32xf32>, vector<32x32xf32>, vector<2x32xf32> -> vector<2x32xf32>
    %228 = arith.addf %224, %227 : vector<2x32xf32>
    %229 = vector.extract_strided_slice %4 {offsets = [0, 0, 0], sizes = [1, 32, 32], strides = [1, 1, 1]} : vector<4x32x32xf32> to vector<1x32x32xf32>
    %230 = vector.shape_cast %229 : vector<1x32x32xf32> to vector<32x32xf32>
    %cst_69 = arith.constant dense<0.000000e+00> : vector<2x32xf32>
    %231 = tpu.matmul %196, %230, %cst_69 {dimension_numbers = #tpu.dot_dimension_numbers<[1], [0], [0], [1], [0, 0, 1, 1], [], []>} : vector<2x32xf32>, vector<32x32xf32>, vector<2x32xf32> -> vector<2x32xf32>
    %232 = arith.addf %228, %231 : vector<2x32xf32>
    %233 = vector.extract_strided_slice %5 {offsets = [0, 0, 0], sizes = [1, 1, 32], strides = [1, 1, 1]} : vector<4x1x32xf32> to vector<1x1x32xf32>
    %234 = vector.shape_cast %233 : vector<1x1x32xf32> to vector<1x32xf32>
    %235 = vector.broadcast %234 : vector<1x32xf32> to vector<2x32xf32>
    %236 = arith.addf %232, %235 : vector<2x32xf32>
    %237 = arith.negf %236 : vector<2x32xf32>
    %238 = math.exp %237 : vector<2x32xf32>
    %cst_70 = arith.constant 1.000000e+00 : f32
    %239 = vector.broadcast %cst_70 : f32 to vector<2x32xf32>
    %240 = arith.addf %239, %238 : vector<2x32xf32>
    %241 = arith.divf %239, %240 : vector<2x32xf32>
    %242 = vector.extract_strided_slice %2 {offsets = [1, 0, 0], sizes = [1, 32, 32], strides = [1, 1, 1]} : vector<4x32x32xf32> to vector<1x32x32xf32>
    %243 = vector.shape_cast %242 : vector<1x32x32xf32> to vector<32x32xf32>
    %cst_71 = arith.constant dense<0.000000e+00> : vector<2x32xf32>
    %244 = tpu.matmul %196, %243, %cst_71 {dimension_numbers = #tpu.dot_dimension_numbers<[1], [0], [0], [1], [0, 0, 1, 1], [], []>} : vector<2x32xf32>, vector<32x32xf32>, vector<2x32xf32> -> vector<2x32xf32>
    %245 = vector.extract_strided_slice %3 {offsets = [1, 0, 0], sizes = [1, 32, 32], strides = [1, 1, 1]} : vector<4x32x32xf32> to vector<1x32x32xf32>
    %246 = vector.shape_cast %245 : vector<1x32x32xf32> to vector<32x32xf32>
    %cst_72 = arith.constant dense<0.000000e+00> : vector<2x32xf32>
    %247 = tpu.matmul %221, %246, %cst_72 {dimension_numbers = #tpu.dot_dimension_numbers<[1], [0], [0], [1], [0, 0, 1, 1], [], []>} : vector<2x32xf32>, vector<32x32xf32>, vector<2x32xf32> -> vector<2x32xf32>
    %248 = arith.addf %244, %247 : vector<2x32xf32>
    %249 = vector.extract_strided_slice %4 {offsets = [1, 0, 0], sizes = [1, 32, 32], strides = [1, 1, 1]} : vector<4x32x32xf32> to vector<1x32x32xf32>
    %250 = vector.shape_cast %249 : vector<1x32x32xf32> to vector<32x32xf32>
    %cst_73 = arith.constant dense<0.000000e+00> : vector<2x32xf32>
    %251 = tpu.matmul %196, %250, %cst_73 {dimension_numbers = #tpu.dot_dimension_numbers<[1], [0], [0], [1], [0, 0, 1, 1], [], []>} : vector<2x32xf32>, vector<32x32xf32>, vector<2x32xf32> -> vector<2x32xf32>
    %252 = arith.addf %248, %251 : vector<2x32xf32>
    %253 = vector.extract_strided_slice %5 {offsets = [1, 0, 0], sizes = [1, 1, 32], strides = [1, 1, 1]} : vector<4x1x32xf32> to vector<1x1x32xf32>
    %254 = vector.shape_cast %253 : vector<1x1x32xf32> to vector<1x32xf32>
    %255 = vector.broadcast %254 : vector<1x32xf32> to vector<2x32xf32>
    %256 = arith.addf %252, %255 : vector<2x32xf32>
    %257 = arith.negf %256 : vector<2x32xf32>
    %258 = math.exp %257 : vector<2x32xf32>
    %cst_74 = arith.constant 1.000000e+00 : f32
    %259 = vector.broadcast %cst_74 : f32 to vector<2x32xf32>
    %260 = arith.addf %259, %258 : vector<2x32xf32>
    %261 = arith.divf %259, %260 : vector<2x32xf32>
    %262 = vector.extract_strided_slice %2 {offsets = [2, 0, 0], sizes = [1, 32, 32], strides = [1, 1, 1]} : vector<4x32x32xf32> to vector<1x32x32xf32>
    %263 = vector.shape_cast %262 : vector<1x32x32xf32> to vector<32x32xf32>
    %cst_75 = arith.constant dense<0.000000e+00> : vector<2x32xf32>
    %264 = tpu.matmul %196, %263, %cst_75 {dimension_numbers = #tpu.dot_dimension_numbers<[1], [0], [0], [1], [0, 0, 1, 1], [], []>} : vector<2x32xf32>, vector<32x32xf32>, vector<2x32xf32> -> vector<2x32xf32>
    %265 = vector.extract_strided_slice %3 {offsets = [2, 0, 0], sizes = [1, 32, 32], strides = [1, 1, 1]} : vector<4x32x32xf32> to vector<1x32x32xf32>
    %266 = vector.shape_cast %265 : vector<1x32x32xf32> to vector<32x32xf32>
    %cst_76 = arith.constant dense<0.000000e+00> : vector<2x32xf32>
    %267 = tpu.matmul %221, %266, %cst_76 {dimension_numbers = #tpu.dot_dimension_numbers<[1], [0], [0], [1], [0, 0, 1, 1], [], []>} : vector<2x32xf32>, vector<32x32xf32>, vector<2x32xf32> -> vector<2x32xf32>
    %268 = arith.addf %264, %267 : vector<2x32xf32>
    %269 = vector.extract_strided_slice %4 {offsets = [2, 0, 0], sizes = [1, 32, 32], strides = [1, 1, 1]} : vector<4x32x32xf32> to vector<1x32x32xf32>
    %270 = vector.shape_cast %269 : vector<1x32x32xf32> to vector<32x32xf32>
    %cst_77 = arith.constant dense<0.000000e+00> : vector<2x32xf32>
    %271 = tpu.matmul %196, %270, %cst_77 {dimension_numbers = #tpu.dot_dimension_numbers<[1], [0], [0], [1], [0, 0, 1, 1], [], []>} : vector<2x32xf32>, vector<32x32xf32>, vector<2x32xf32> -> vector<2x32xf32>
    %272 = arith.addf %268, %271 : vector<2x32xf32>
    %273 = vector.extract_strided_slice %5 {offsets = [2, 0, 0], sizes = [1, 1, 32], strides = [1, 1, 1]} : vector<4x1x32xf32> to vector<1x1x32xf32>
    %274 = vector.shape_cast %273 : vector<1x1x32xf32> to vector<1x32xf32>
    %275 = vector.broadcast %274 : vector<1x32xf32> to vector<2x32xf32>
    %276 = arith.addf %272, %275 : vector<2x32xf32>
    %277 = math.tanh %276 : vector<2x32xf32>
    %278 = vector.extract_strided_slice %2 {offsets = [3, 0, 0], sizes = [1, 32, 32], strides = [1, 1, 1]} : vector<4x32x32xf32> to vector<1x32x32xf32>
    %279 = vector.shape_cast %278 : vector<1x32x32xf32> to vector<32x32xf32>
    %cst_78 = arith.constant dense<0.000000e+00> : vector<2x32xf32>
    %280 = tpu.matmul %196, %279, %cst_78 {dimension_numbers = #tpu.dot_dimension_numbers<[1], [0], [0], [1], [0, 0, 1, 1], [], []>} : vector<2x32xf32>, vector<32x32xf32>, vector<2x32xf32> -> vector<2x32xf32>
    %281 = vector.extract_strided_slice %3 {offsets = [3, 0, 0], sizes = [1, 32, 32], strides = [1, 1, 1]} : vector<4x32x32xf32> to vector<1x32x32xf32>
    %282 = vector.shape_cast %281 : vector<1x32x32xf32> to vector<32x32xf32>
    %cst_79 = arith.constant dense<0.000000e+00> : vector<2x32xf32>
    %283 = tpu.matmul %221, %282, %cst_79 {dimension_numbers = #tpu.dot_dimension_numbers<[1], [0], [0], [1], [0, 0, 1, 1], [], []>} : vector<2x32xf32>, vector<32x32xf32>, vector<2x32xf32> -> vector<2x32xf32>
    %284 = arith.addf %280, %283 : vector<2x32xf32>
    %285 = vector.extract_strided_slice %4 {offsets = [3, 0, 0], sizes = [1, 32, 32], strides = [1, 1, 1]} : vector<4x32x32xf32> to vector<1x32x32xf32>
    %286 = vector.shape_cast %285 : vector<1x32x32xf32> to vector<32x32xf32>
    %cst_80 = arith.constant dense<0.000000e+00> : vector<2x32xf32>
    %287 = tpu.matmul %196, %286, %cst_80 {dimension_numbers = #tpu.dot_dimension_numbers<[1], [0], [0], [1], [0, 0, 1, 1], [], []>} : vector<2x32xf32>, vector<32x32xf32>, vector<2x32xf32> -> vector<2x32xf32>
    %288 = arith.addf %284, %287 : vector<2x32xf32>
    %289 = vector.extract_strided_slice %5 {offsets = [3, 0, 0], sizes = [1, 1, 32], strides = [1, 1, 1]} : vector<4x1x32xf32> to vector<1x1x32xf32>
    %290 = vector.shape_cast %289 : vector<1x1x32xf32> to vector<1x32xf32>
    %291 = vector.broadcast %290 : vector<1x32xf32> to vector<2x32xf32>
    %292 = arith.addf %288, %291 : vector<2x32xf32>
    %293 = arith.negf %292 : vector<2x32xf32>
    %294 = math.exp %293 : vector<2x32xf32>
    %cst_81 = arith.constant 1.000000e+00 : f32
    %295 = vector.broadcast %cst_81 : f32 to vector<2x32xf32>
    %296 = arith.addf %295, %294 : vector<2x32xf32>
    %297 = arith.divf %295, %296 : vector<2x32xf32>
    %298 = arith.mulf %261, %194 : vector<2x32xf32>
    %299 = arith.mulf %241, %277 : vector<2x32xf32>
    %300 = arith.addf %298, %299 : vector<2x32xf32>
    %301 = math.tanh %300 : vector<2x32xf32>
    %302 = arith.mulf %297, %301 : vector<2x32xf32>
    %cst_82 = arith.constant dense<0.000000e+00> : vector<2x16xf32>
    %303 = tpu.matmul %302, %0, %cst_82 {dimension_numbers = #tpu.dot_dimension_numbers<[1], [1], [0], [0], [0, 0, 1, 0], [], []>} : vector<2x32xf32>, vector<16x32xf32>, vector<2x16xf32> -> vector<2x16xf32>
    %cst_83 = arith.constant 0xFF800000 : f32
    %304 = vector.broadcast %cst_83 : f32 to vector<2x16xf32>
    %305 = arith.select %8, %303, %304 : vector<2x16xi1>, vector<2x16xf32>
    %cst_84 = arith.constant dense<0xFF800000> : vector<2xf32>
    %306 = vector.multi_reduction <maximumf>, %305, %cst_84 [1] : vector<2x16xf32> to vector<2xf32>
    %307 = vector.shape_cast %306 : vector<2xf32> to vector<2x1xf32>
    %cst_85 = arith.constant 0xFF800000 : f32
    %308 = vector.broadcast %cst_85 : f32 to vector<2x1xf32>
    %309 = arith.cmpf oeq, %307, %308 : vector<2x1xf32>
    %cst_86 = arith.constant 0.000000e+00 : f32
    %310 = vector.broadcast %cst_86 : f32 to vector<2x1xf32>
    %311 = arith.select %309, %310, %307 : vector<2x1xi1>, vector<2x1xf32>
    %312 = vector.broadcast %311 : vector<2x1xf32> to vector<2x16xf32>
    %313 = arith.subf %303, %312 : vector<2x16xf32>
    %314 = math.exp %313 : vector<2x16xf32>
    %cst_87 = arith.constant 0.000000e+00 : f32
    %315 = vector.broadcast %cst_87 : f32 to vector<2x16xf32>
    %316 = arith.select %8, %314, %315 : vector<2x16xi1>, vector<2x16xf32>
    %cst_88 = arith.constant dense<0.000000e+00> : vector<2xf32>
    %317 = vector.multi_reduction <add>, %316, %cst_88 [1] : vector<2x16xf32> to vector<2xf32>
    %318 = vector.shape_cast %317 : vector<2xf32> to vector<2x1xf32>
    %cst_89 = arith.constant dense<0.000000e+00> : vector<2x32xf32>
    %319 = tpu.matmul %316, %0, %cst_89 {dimension_numbers = #tpu.dot_dimension_numbers<[1], [0], [0], [1], [0, 0, 1, 1], [], []>} : vector<2x16xf32>, vector<16x32xf32>, vector<2x32xf32> -> vector<2x32xf32>
    %cst_90 = arith.constant 0.000000e+00 : f32
    %320 = vector.broadcast %cst_90 : f32 to vector<2x1xf32>
    %321 = arith.cmpf ogt, %318, %320 : vector<2x1xf32>
    %cst_91 = arith.constant 1.000000e+00 : f32
    %322 = vector.broadcast %cst_91 : f32 to vector<2x1xf32>
    %323 = arith.select %321, %318, %322 : vector<2x1xi1>, vector<2x1xf32>
    %cst_92 = arith.constant 1.000000e+00 : f32
    %324 = vector.broadcast %cst_92 : f32 to vector<2x1xf32>
    %325 = arith.divf %324, %323 : vector<2x1xf32>
    %326 = vector.broadcast %325 : vector<2x1xf32> to vector<2x32xf32>
    %327 = arith.mulf %319, %326 : vector<2x32xf32>
    %328 = tpu.concatenate %302, %327 in 1 : vector<2x32xf32>, vector<2x32xf32> -> vector<2x64xf32>
    %c0_93 = arith.constant 0 : index
    %c0_94 = arith.constant 0 : index
    %329 = vector.load %arg6[%c0_93, %c0_94] : memref<2x64xf32, #tpu.memory_space<vmem>>, vector<2x64xf32>
    tpu.vector_store %arg6[%c0_93, %c0_94], %328 {strides = array<i32>} : memref<2x64xf32, #tpu.memory_space<vmem>>, vector<2x64xf32>,
    return
  }
}

</mosaic_0001>

<bundles_post_ra>
// kernel: tpu_custom_call.1
= control target key start
LH: loop header
LB: loop body
LE: loop exit
PB: predicated region body
PF: predicated region fallthrough
CT: control target
= control target key end

     0   :  { %11 = vsyncpa [#allocation3], 0  ;;  %s2103_s0 = inlined_call_operand.hbm [shape: f32[16,32], index: 0, kind: input, shape index: {}]   ;;  %s2104_s1 = inlined_call_operand.hbm [shape: s32[1,16], index: 1, kind: input, shape index: {}]   ;;  %s2105_s2 = inlined_call_operand.hbm [shape: f32[4,32,32], index: 2, kind: input, shape index: {}]   ;;  %s2106_s3 = inlined_call_operand.hbm [shape: f32[4,32,32], index: 3, kind: input, shape index: {}]   ;;  %s2107_s4 = inlined_call_operand.hbm [shape: f32[4,32,32], index: 4, kind: input, shape index: {}]   ;;  %s2108_s5 = inlined_call_operand.vmem [shape: f32[4,1,32], index: 5, kind: input, shape index: {}]   ;;  %s2109_s6 = inlined_call_operand.hbm [shape: f32[2,64], index: 6, kind: output, shape index: {}]  }
   0x1   :  { %12 = vsyncpa [#allocation6], 0 }
   0x2   :  { %13 = vsyncpa [#allocation9], 0  ;;  %s33_s23 = sshll.u32 %s2104_s1, 4  ;;  %s34_s23 = int_to_ptr.hbm [resolvable:$true] %s33_s23 }
   0x3   :  { %14 = vsyncpa [#allocation4], 0  ;;  %s1651_s24 = smov [#allocation5]   ;;  %s56_s28 = sshll.u32 %s2106_s3, 4  ;;  %s57_s28 = int_to_ptr.hbm [resolvable:$true] %s56_s28 }
   0x4   :  { %s35_s25 = sshll.u32 %s1651_s24, 4  ;;  %s1652_s29 = smov [#allocation8]   ;;  %s36_s25 = int_to_ptr.vmem [resolvable:$true] %s35_s25 }
   0x5   :  { %38 = dma.hbm_to_vmem [thread:$0]  %s34_s23, 16, %s36_s25, [#allocation6]  }
   0x6   :  { %s58_s30 = sshll.u32 %s1652_s29, 4  ;;  %s19_s9 = sshll.u32 %s2103_s0, 4  ;;  %s59_s30 = int_to_ptr.vmem [resolvable:$true] %s58_s30  ;;  %s20_s9 = int_to_ptr.hbm [resolvable:$true] %s19_s9 }
   0x7   :  { %s1653_s1 = smov 128   ;;  %s1654_s10 = smov 8  }
   0x8   :  { %64 = dma.hbm_to_vmem [thread:$0]  %s57_s28, 2048, %s59_s30, [#allocation9], %s1653_s1, %s1653_s1, %s1654_s10  }
   0x9   :  { %s43_s13 = sshll.u32 %s2105_s2, 4  ;;  %s1655_s14 = smov [#allocation2]   ;;  %s44_s13 = int_to_ptr.hbm [resolvable:$true] %s43_s13 }
   0xa   :  { %s21_s15 = sshll.u32 %s1655_s14, 4  ;;  %s1656_s3 = smov [#allocation7]   ;;  %s22_s15 = int_to_ptr.vmem [resolvable:$true] %s21_s15 }
   0xb   :  { %27 = dma.hbm_to_vmem [thread:$0]  %s20_s9, 256, %s22_s15, [#allocation3], %s1653_s1, %s1653_s1, %s1654_s10  }
   0xc   :  { %s45_s16 = sshll.u32 %s1656_s3, 4  ;;  %s69_s0 = sshll.u32 %s2107_s4, 4  ;;  %s46_s16 = int_to_ptr.vmem [resolvable:$true] %s45_s16  ;;  %s70_s0 = int_to_ptr.hbm [resolvable:$true] %s69_s0 }
   0xd   :  { %51 = dma.hbm_to_vmem [thread:$0]  %s44_s13, 2048, %s46_s16, [#allocation6], %s1653_s1, %s1653_s1, %s1654_s10  }
   0xe   :  { %s1657_s19 = smov [#allocation10]  }
   0xf   :  { %s71_s20 = sshll.u32 %s1657_s19, 4  ;;  %s72_s20 = int_to_ptr.vmem [resolvable:$true] %s71_s20 }
  0x10   :  { %77 = dma.hbm_to_vmem [thread:$0]  %s70_s0, 2048, %s72_s20, [#allocation9], %s1653_s1, %s1653_s1, %s1654_s10  }
  0x11   :  { %1643 = dma.done.wait [#allocation3], 256  }
  0x12   :  { %1644 = vsyncadd [#allocation3], 4294967040 }
  0x13   :  { %1645 = dma.done.wait [#allocation6], 2064  }
  0x14   :  { %1646 = vsyncadd [#allocation6], 4294965232 }
  0x15   :  { %1647 = dma.done.wait [#allocation9], 4096  }
  0x16   :  { %1648 = vsyncadd [#allocation9], 4294963200  ;;  %v1711_v0 = vld [vmem:[#allocation8 + $0x18] sm:$0xff]  ;;  %v1719_v3 = vld [vmem:[#allocation8 + $0x10] sm:$0xff]  ;;  %v1658_v17 = vmov 0.0   ;;  %vm159_vm0 = vcmask 261120  }
  0x17   :  { %v1713_v1 = vld [vmem:[#allocation10 + $0x18] sm:$0xff]  ;;  %175 = vmatpush.msra.mxu0 %v1711_v0  ;;  %v1723_v5 = vld [vmem:[#allocation10 + $0x10] sm:$0xff]  ;;  %v1729_v7 = vld [vmem:[#allocation8 + $0x8] sm:$0xff]  ;;  %vm516_vm14 = vcmask 123904   ;;  %s1660_s27 = smov [#allocation11]   ;;  %s1367_s7 = sshll.u32 %s2109_s6, 4  ;;  %s1368_s7 = int_to_ptr.hbm [resolvable:$true] %s1367_s7 }
  0x18   :  { %2128 = vst [vmem:[#allocation16_spill] sm:$0xff] %v1713_v1  ;;  %v1715_v2 = vld [vmem:[#allocation8 + $0x38] sm:$0xff]  ;;  %215 = vmatpush.msra.mxu2 %v1713_v1  ;;  %v1727_v6 = vld [vmem:[#allocation8 + $0x30] sm:$0xff]  ;;  %v1735_v9 = vld [vmem:[#allocation10 + $0x8] sm:$0xff]  ;;  %s1365_s28 = sshll.u32 %s1660_s27, 4  ;;  %s1366_s28 = int_to_ptr.vmem [resolvable:$true] %s1365_s28 }
  0x19   :  { %v1721_v4 = vld [vmem:[#allocation7 + $0x18] sm:$0xff]  ;;  %2129 = vst [vmem:[#allocation17_spill] sm:$0xff] %v1723_v5  ;;  %259 = vmatpush.msra.mxu3 %v1715_v2  ;;  %v1731_v8 = vld [vmem:[#allocation7 + $0x10] sm:$0xff]  ;;  %176 = vmatpush.msra.mxu0 %v1719_v3  ;;  %v1737_v10 = vld [vmem:[#allocation8 + $0x28] sm:$0xff] }
  0x1a   :  { %195 = vmatpush.msra.mxu1 %v1721_v4  ;;  %216 = vmatpush.msra.mxu2 %v1723_v5  ;;  %2130 = vst [vmem:[#allocation18_spill] sm:$0xff] %v1735_v9  ;;  %v1741_v11 = vld [vmem:[#allocation8] sm:$0xff]  ;;  %v1743_v12 = vld [vmem:[#allocation7 + $0x8] sm:$0xff]  ;;  %v1755_v15 = vld [vmem:[#allocation8 + $0x58] sm:$0xff] }
  0x1b   :  { %260 = vmatpush.msra.mxu3 %v1727_v6  ;;  %v1745_v13 = vld [vmem:[#allocation10] sm:$0xff]  ;;  %177 = vmatpush.msra.mxu0 %v1729_v7  ;;  %v1761_v18 = vld [vmem:[#allocation7 + $0x38] sm:$0xff]  ;;  %v1767_v20 = vld [vmem:[#allocation8 + $0x50] sm:$0xff] }
  0x1c   :  { %196 = vmatpush.msra.mxu1 %v1731_v8  ;;  %2131 = vst [vmem:[#allocation19_spill] sm:$0xff] %v1745_v13  ;;  %217 = vmatpush.msra.mxu2 %v1735_v9  ;;  %v1749_v14 = vld [vmem:[#allocation8 + $0x20] sm:$0xff]  ;;  %v1763_v19 = vld [vmem:[#allocation7 + $0x58] sm:$0xff]  ;;  %v1771_v21 = vld [vmem:[#allocation7 + $0x30] sm:$0xff] }
  0x1d   :  { %261 = vmatpush.msra.mxu3 %v1737_v10  ;;  %178 = vmatpush.msra.mxu0 %v1741_v11  ;;  %v1757_v16 = vld [vmem:[#allocation7] sm:$0xff]  ;;  %v1773_v22 = vld [vmem:[#allocation10 + $0x38] sm:$0xff]  ;;  %v1777_v23 = vld [vmem:[#allocation7 + $0x50] sm:$0xff] }
  0x1e   :  { %197 = vmatpush.msra.mxu1 %v1743_v12  ;;  %218 = vmatpush.msra.mxu2 %v1745_v13  ;;  %2132 = vst [vmem:[#allocation20_spill] sm:$0xff] %v1773_v22  ;;  %v1779_v24 = vld [vmem:[#allocation8 + $0x48] sm:$0xff]  ;;  %v1785_v26 = vld [vmem:[#allocation10 + $0x30] sm:$0xff]  ;;  %v1791_v28 = vld [vmem:[#allocation8 + $0x40] sm:$0xff] }
  0x1f   :  { %262 = vmatpush.msra.mxu3 %v1749_v14  ;;  %179 = vmatmul.f32.vlgmr.msra.gmra.mxu0 %v1658_v17  ;;  %v1783_v25 = vld [vmem:[#allocation7 + $0x28] sm:$0xff]  ;;  %2134 = vst [vmem:[#allocation22_spill] sm:$0xff] %v1785_v26  ;;  %v1795_v29 = vld [vmem:[#allocation7 + $0x20] sm:$0xff]  ;;  %v1803_v32 = vld [vmem:[#allocation7 + $0x78] sm:$0xff] }
  0x20   :  { %219 = vmatmul.f32.vlgmr.msra.gmra.mxu2 %v1658_v17  ;;  %263 = vmatmul.f32.vlgmr.msra.gmra.mxu3 %v1658_v17  ;;  %2133 = vst [vmem:[#allocation21_spill] sm:$0xff] %v1783_v25  ;;  %v1789_v27 = vld [vmem:[#allocation7 + $0x48] sm:$0xff]  ;;  %v1801_v31 = vld [vmem:[#allocation7 + $0x40] sm:$0xff]  ;;  %v1813_v34 = vld [vmem:[#allocation10 + $0x58] sm:$0xff] }
  0x21   :  { %343 = vmatpush.msrb.mxu2 %v1755_v15  ;;  %198 = vmatpush.msra.mxu1 %v1757_v16  ;;  %2135 = vst [vmem:[#allocation23_spill] sm:$0xff] %v1795_v29  ;;  %v1797_v30 = vld [vmem:[#allocation10 + $0x28] sm:$0xff]  ;;  %v1809_v33 = vld [vmem:[#allocation10 + $0x20] sm:$0xff]  ;;  %v1817_v35 = vld [vmem:[#allocation7 + $0x70] sm:$0xff] }
  0x22   :  { %279 = vmatpush.msrb.mxu0 %v1761_v18  ;;  %363 = vmatpush.msrb.mxu3 %v1763_v19  ;;  %2136 = vst [vmem:[#allocation24_spill] sm:$0xff] %v1797_v30  ;;  %v1819_v36 = vld [vmem:[#allocation10 + $0x78] sm:$0xff]  ;;  %v1823_v37 = vld [vmem:[#allocation10 + $0x50] sm:$0xff]  ;;  %v1829_v39 = vld [vmem:[#allocation7 + $0x68] sm:$0xff] }
  0x23   :  { %199 = vmatmul.f32.vlgmr.msra.gmra.mxu1 %v1658_v17  ;;  %344 = vmatpush.msrb.mxu2 %v1767_v20  ;;  %2137 = vst [vmem:[#allocation25_spill] sm:$0xff] %v1809_v33  ;;  %v1825_v38 = vld [vmem:[#allocation8 + $0x78] sm:$0xff]  ;;  %v1831_v40 = vld [vmem:[#allocation10 + $0x70] sm:$0xff]  ;;  %v1835_v41 = vld [vmem:[#allocation10 + $0x48] sm:$0xff] }
  0x24   :  { %280 = vmatpush.msrb.mxu0 %v1771_v21  ;;  %299 = vmatpush.msrb.mxu1 %v1773_v22  ;;  %v1837_v42 = vld [vmem:[#allocation8 + $0x70] sm:$0xff]  ;;  %v1841_v43 = vld [vmem:[#allocation7 + $0x60] sm:$0xff]  ;;  %v1843_v44 = vld [vmem:[#allocation10 + $0x68] sm:$0xff] }
  0x25   :  { %364 = vmatpush.msrb.mxu3 %v1777_v23  ;;  %345 = vmatpush.msrb.mxu2 %v1779_v24  ;;  %v1847_v45 = vld [vmem:[#allocation10 + $0x40] sm:$0xff]  ;;  %v1855_v47 = vld [vmem:[#allocation8 + $0x68] sm:$0xff] }
  0x26   :  { %281 = vmatpush.msrb.mxu0 %v1783_v25  ;;  %300 = vmatpush.msrb.mxu1 %v1785_v26  ;;  %v1851_v46 = vld [vmem:[#allocation10 + $0x60] sm:$0xff]  ;;  %v1886_v52 = vld [vmem:[%s2108_s5] ss:$0 sm:$0xff]  ;;  %v1892_v60 = vld [vmem:[%s2108_s5 + $0x1] ss:$0 sm:$0xff] }
  0x27   :  { %365 = vmatpush.msrb.mxu3 %v1789_v27  ;;  %346 = vmatpush.msrb.mxu2 %v1791_v28  ;;  %v1861_v48 = vld [vmem:[#allocation8 + $0x60] sm:$0xff]  ;;  %2138 = vst [vmem:[#allocation26_spill] sm:$0xff] %v1886_v52 }
  0x28   :  { %282 = vmatpush.msrb.mxu0 %v1795_v29  ;;  %301 = vmatpush.msrb.mxu1 %v1797_v30  ;;  %2139 = vst [vmem:[#allocation27_spill] sm:$0xff] %v1892_v60 }
  0x29   :  { %366 = vmatpush.msrb.mxu3 %v1801_v31  ;;  %283 = vmatmul.f32.vlgmr.msrb.gmra.mxu0 %v1658_v17 }
  0x2a   :  { %347 = vmatmul.f32.vlgmr.msrb.gmra.mxu2 %v1658_v17  ;;  %367 = vmatmul.f32.vlgmr.msrb.gmra.mxu3 %v1658_v17 }
  0x2b   :  { %429 = vmatpush.msra.mxu2 %v1803_v32  ;;  %302 = vmatpush.msrb.mxu1 %v1809_v33 }
  0x2c   :  { %383 = vmatpush.msra.mxu0 %v1813_v34  ;;  %303 = vmatmul.f32.vlgmr.msrb.gmra.mxu1 %v1658_v17 }
  0x2d   :  { %430 = vmatpush.msra.mxu2 %v1817_v35  ;;  %449 = vmatpush.msra.mxu3 %v1819_v36 }
  0x2e   :  { %384 = vmatpush.msra.mxu0 %v1823_v37  ;;  %409 = vmatpush.msra.mxu1 %v1825_v38 }
  0x2f   :  { %431 = vmatpush.msra.mxu2 %v1829_v39  ;;  %450 = vmatpush.msra.mxu3 %v1831_v40 }
  0x30   :  { %385 = vmatpush.msra.mxu0 %v1835_v41  ;;  %410 = vmatpush.msra.mxu1 %v1837_v42 }
  0x31   :  { %432 = vmatpush.msra.mxu2 %v1841_v43  ;;  %451 = vmatpush.msra.mxu3 %v1843_v44 }
  0x32   :  { %386 = vmatpush.msra.mxu0 %v1847_v45  ;;  %433 = vmatmul.f32.vlgmr.msra.gmra.mxu2 %v1658_v17 }
  0x33   :  { %387 = vmatmul.f32.vlgmr.msra.gmra.mxu0 %v1658_v17  ;;  %452 = vmatpush.msra.mxu3 %v1851_v46 }
  0x34   :  { %411 = vmatpush.msra.mxu1 %v1855_v47  ;;  %453 = vmatmul.f32.vlgmr.msra.gmra.mxu3 %v1658_v17 }
  0x35   :  { %606 = vmatpush.msrb.mxu3 %v1721_v4  ;;  %586 = vmatpush.msrb.mxu2 %v1711_v0 }
  0x36   :  { %412 = vmatpush.msra.mxu1 %v1861_v48 }
  0x37   :  { %413 = vmatmul.f32.vlgmr.msra.gmra.mxu1 %v1658_v17  ;;  %607 = vmatpush.msrb.mxu3 %v1731_v8 }
  0x38   :  { %587 = vmatpush.msrb.mxu2 %v1719_v3 }
  0x39   :  { %608 = vmatpush.msrb.mxu3 %v1743_v12 }
  0x3a   :  { %588 = vmatpush.msrb.mxu2 %v1729_v7 }
  0x3b   :  { %609 = vmatpush.msrb.mxu3 %v1757_v16 }
  0x3c   :  { %589 = vmatpush.msrb.mxu2 %v1741_v11 }
  0x3d   :  { %707 = vmatpush.msra.mxu3 %v1773_v22 }
  0x3e   :  { %687 = vmatpush.msra.mxu2 %v1761_v18 }
  0x3f   :  { %708 = vmatpush.msra.mxu3 %v1785_v26 }
  0x40   :  { %688 = vmatpush.msra.mxu2 %v1771_v21 }
  0x41   :  { %709 = vmatpush.msra.mxu3 %v1797_v30 }
  0x42   :  { %689 = vmatpush.msra.mxu2 %v1783_v25 }
  0x43   :  { %710 = vmatpush.msra.mxu3 %v1809_v33 }
  0x44   :  { %690 = vmatpush.msra.mxu2 %v1795_v29 }
  0x9c   :  { %v180_v49 = vpop.f32.mrf.mxu0 }
  0xa0   :  { %v200_v50 = vpop.f32.mrf.mxu1 }
  0xa1   :  { %v201_v51 = vadd.f32 %v200_v50, %v180_v49 }
  0xa3   :  { %v220_v53 = vpop.f32.mrf.mxu2  ;;  %v264_v55 = vpop.f32.mrf.mxu3 }
  0xa4   :  { %v223_v54 = vadd.f32 %v220_v53, %v201_v51 }
  0xa6   :  { %v227_v56 = vadd.f32 %v1886_v52, %v223_v54  ;;  %v284_v57 = vpop.f32.mrf.mxu0 }
  0xa7   :  { %v285_v58 = vadd.f32 %v284_v57, %v264_v55  ;;  %v1895_v55 = vld [vmem:[#allocation2 + $0x8] sm:$0xff] }
  0xa8   :  { %v1379_v59 = vmul.f32 -1.442695, %v227_v56  ;;  %1382 = vmatpush.xpose.msk.msrb.mxu0 %vm159_vm0, %v1895_v55  ;;  %547 = vmatpush.msrb.mxu1 %v1895_v55 }
  0xa9   :  { %v304_v61 = vpop.f32.mrf.mxu1 }
  0xaa   :  { %1439 = vpow2.f32 %v1379_v59  ;;  %v307_v62 = vadd.f32 %v304_v61, %v285_v58  ;;  %v1903_v59 = vld [vmem:[%s2108_s5 + $0x3] ss:$0 sm:$0xff] }
  0xab   :  { %2140 = vst [vmem:[#allocation28_spill] sm:$0xff] %v1903_v59 }
  0xac   :  { %v311_v63 = vadd.f32 %v1892_v60, %v307_v62 }
  0xad   :  { %v348_v17 = vpop.f32.mrf.mxu2  ;;  %v368_v50 = vpop.f32.mrf.mxu3 }
  0xae   :  { %v1380_v49 = vmul.f32 -1.442695, %v311_v63  ;;  %v369_v63 = vadd.f32 %v368_v50, %v348_v17  ;;  %v1916_v50 = vld [vmem:[%s2108_s5 + $0x2] ss:$0 sm:$0xff]  ;;  %s1659_s5 = smov 32  }
  0xaf   :  { %2141 = vst [vmem:[#allocation29_spill] sm:$0xff] %v1916_v50 }
  0xb0   :  { %v1440_v51 = vpop.eup %1439  ;;  %1441 = vpow2.f32 %v1380_v49  ;;  %v388_v52 = vpop.f32.mrf.mxu0 }
  0xb1   :  { %v231_v53 = vadd.f32 1.0, %v1440_v51  ;;  %v1905_v51 = vld [vmem:[#allocation2] sm:$0xff]  ;;  %v391_v17 = vadd.f32 %v388_v52, %v369_v63 }
  0xb2   :  { %1383 = vmatpush.xpose.msk.msrb.mxu0 %vm159_vm0, %v1905_v51  ;;  %548 = vmatpush.msrb.mxu1 %v1905_v51 }
  0xb3   :  { %1443 = vrcp.f32 %v231_v53  ;;  %v395_v52 = vadd.f32 %v1916_v50, %v391_v17  ;;  %vm237_vm2 = vweird.f32 %v231_v53 }
  0xb4   :  { %v414_v54 = vpop.f32.mrf.mxu1  ;;  %667 = vmatpush.msra.mxu1 %v1715_v2 }
  0xb5   :  { %v434_v56 = vpop.f32.mrf.mxu2 }
  0xb6   :  { %v1442_v57 = vpop.eup %1441  ;;  %v435_v58 = vadd.f32 %v434_v56, %v414_v54  ;;  %626 = vmatpush.msra.mxu0 %v1713_v1  ;;  %668 = vmatpush.msra.mxu1 %v1727_v6 }
  0xb7   :  { %v315_v61 = vadd.f32 1.0, %v1442_v57  ;;  %v454_v62 = vpop.f32.mrf.mxu3 }
  0xb8   :  { %v457_v49 = vadd.f32 %v454_v62, %v435_v58  ;;  %627 = vmatpush.msra.mxu0 %v1723_v5  ;;  %669 = vmatpush.msra.mxu1 %v1737_v10 }
  0xb9   :  { %v1444_v60 = vpop.eup %1443  ;;  %1445 = vrcp.f32 %v315_v61  ;;  %v327_v33 = vand.u32 2147483648, %v315_v61  ;;  %vm321_vm5 = vweird.f32 %v315_v61 }
  0xba   :  { %v233_v54 = vmul.f32 %v1444_v60, %v231_v53  ;;  %v461_v56 = vadd.f32 %v1903_v59, %v457_v49  ;;  %628 = vmatpush.msra.mxu0 %v1735_v9  ;;  %670 = vmatpush.msra.mxu1 %v1749_v14  ;;  %vm238_vm1 = vweird.f32 %v1444_v60  ;;  %v325_v9 = vand.u32 2147483647, %v315_v61 }
  0xbb   :  { %vm239_vm3 = vmor %vm237_vm2, %vm238_vm1  ;;  %vm529_vm1 = vcmask 130048  }
  0xbc   :  { %v234_v57 = vsub.f32 1.0, %v233_v54  ;;  %v1381_v58 = vmul.f32 -1.442695, %v461_v56  ;;  %629 = vmatpush.msra.mxu0 %v1745_v13  ;;  %v243_v56 = vand.u32 2147483648, %v231_v53  ;;  %v328_v13 = vor.u32 1.1754944e-38, %v327_v33 }
  0xbd   :  { %vm326_vm8 = vcmp.eq.f32.partialorder %v325_v9, 8.507059e+37 }
  0xbe   :  { %v235_v62 = vmul.f32 %v1444_v60, %v234_v57  ;;  %1447 = vpow2.f32 %v1381_v58  ;;  %v241_v57 = vand.u32 2147483647, %v231_v53  ;;  %v244_v17 = vor.u32 1.1754944e-38, %v243_v56 }
  0xbf   :  { %v1446_v49 = vpop.eup %1445  ;;  %1449 = vtanh.f32 %v395_v52 }
  0xc0   :  { %v317_v59 = vmul.f32 %v1446_v49, %v315_v61  ;;  %v236_v63 = vadd.f32 %v1444_v60, %v235_v62  ;;  %vm322_vm4 = vweird.f32 %v1446_v49  ;;  %vm242_vm6 = vcmp.eq.f32.partialorder %v241_v57, 8.507059e+37 }
  0xc1   :  { %vm323_vm7 = vmor %vm321_vm5, %vm322_vm4 }
  0xc2   :  { %v318_v54 = vsub.f32 1.0, %v317_v59  ;;  %v240_v29 = vsel %vm239_vm3, %v1444_v60, %v236_v63 }
  0xc3   :  { %v245_v59 = vsel %vm242_vm6, %v244_v17, %v240_v29 }
  0xc4   :  { %v1448_v58 = vpop.eup %1447  ;;  %v319_v30 = vmul.f32 %v1446_v49, %v318_v54 }
  0xc5   :  { %v465_v26 = vadd.f32 1.0, %v1448_v58  ;;  %v1450_v53 = vpop.eup %1449 }
  0xc6   :  { %v320_v50 = vadd.f32 %v1446_v49, %v319_v30  ;;  %v482_v54 = vmul.f32 %v1450_v53, %v245_v59 }
  0xc7   :  { %1451 = vrcp.f32 %v465_v26  ;;  %v477_v61 = vand.u32 2147483648, %v465_v26  ;;  %v475_v33 = vand.u32 2147483647, %v465_v26  ;;  %vm471_vm10 = vweird.f32 %v465_v26 }
  0xc8   :  { %v324_v62 = vsel %vm323_vm7, %v1446_v49, %v320_v50 }
  0xc9   :  { %v329_v5 = vsel %vm326_vm8, %v328_v13, %v324_v62  ;;  %v478_v29 = vor.u32 1.1754944e-38, %v477_v61  ;;  %vm476_vm12 = vcmp.eq.f32.partialorder %v475_v33, 8.507059e+37 }
  0xca   :  { %v481_v25 = vmul.f32 0.0, %v329_v5 }
  0xcc   :  { %v1925_v1 = vadd.f32 %v482_v54, %v481_v25 }
  0xcd   :  { %v1452_v22 = vpop.eup %1451 }
  0xce   :  { %v467_v52 = vmul.f32 %v1452_v22, %v465_v26  ;;  %1453 = vtanh.f32 %v1925_v1  ;;  %vm472_vm9 = vweird.f32 %v1452_v22  ;;  %v1438_v26 = vld [vmem:[#allocation5] ss:$0 sm:$0xff] }
  0xcf   :  { %vm473_vm11 = vmor %vm471_vm10, %vm472_vm9 }
  0xd0   :  { %v468_v60 = vsub.f32 1.0, %v467_v52 }
  0xd2   :  { %v469_v30 = vmul.f32 %v1452_v22, %v468_v60 }
  0xd4   :  { %v470_v63 = vadd.f32 %v1452_v22, %v469_v30  ;;  %v1454_v13 = vpop.eup %1453 }
  0xd6   :  { %v474_v9 = vsel %vm473_vm11, %v1452_v22, %v470_v63  ;;  %v155_v22 = vlaneseq }
  0xd7   :  { %v479_v5 = vsel %vm476_vm12, %v478_v29, %v474_v9 }
  0xd8   :  { %v1928_v50 = vmul.f32 %v1454_v13, %v479_v5  ;;  %v156_v25 = vshrl.u32 %v155_v22, 7 }
  0xda   :  { %1384 = vmatmul.msk.f32.vlgmr.msrb.gmra.mxu0 %vm159_vm0, %v1928_v50  ;;  %1387 = vmatmul.msk.f32.vlgmr.msrb.gmra.mxu3 %vm159_vm0, %v1928_v50  ;;  %vm1952_vm13 = vcmp.eq.s32.totalorder %v156_v25, %v1438_v26 }
  0xdb   :  { %748 = vmatpush.msrb.mxu0 %v1755_v15  ;;  %811 = vmatpush.msrb.mxu3 %v1825_v38 }
  0xdd   :  { %749 = vmatpush.msrb.mxu0 %v1767_v20  ;;  %812 = vmatpush.msrb.mxu3 %v1837_v42 }
  0xdf   :  { %750 = vmatpush.msrb.mxu0 %v1779_v24  ;;  %813 = vmatpush.msrb.mxu3 %v1855_v47 }
  0xe1   :  { %751 = vmatpush.msrb.mxu0 %v1791_v28  ;;  %814 = vmatpush.msrb.mxu3 %v1861_v48 }
  0xe2   :  { %1388 = vmatmul.msk.f32.vlgmr.msra.gmra.mxu0 %vm159_vm0, %v1928_v50  ;;  %1392 = vmatmul.msk.f32.vlgmr.msra.gmra.mxu3 %vm159_vm0, %v1928_v50 }
  0xe3   :  { %831 = vmatpush.msra.mxu0 %v1803_v32  ;;  %938 = vmatpush.msra.mxu3 %v1895_v55 }
  0xe5   :  { %832 = vmatpush.msra.mxu0 %v1817_v35  ;;  %939 = vmatpush.msra.mxu3 %v1905_v51 }
  0xe7   :  { %833 = vmatpush.msra.mxu0 %v1829_v39 }
  0xe9   :  { %834 = vmatpush.msra.mxu0 %v1841_v43 }
 0x157   :  { %v512_v56 = vpop.f32.mrf.mxu0 }
 0x158   :  { %v515_v57 = vsel %vm1952_vm13, %v512_v56, -inf }
 0x159   :  { %v517_v58 = vsel %vm516_vm14, %v515_v57, -inf }
 0x15a   :  { %518 = vmax.xlane.f32.xlu0 %v517_v58 }
 0x1cd   :  { %v519_v17 = vpop.xlane.xlu0 %518 }
 0x1ce   :  { %vm520_vm15 = vcmp.eq.f32.partialorder %v519_v17, -inf }
 0x1cf   :  { %v521_v59 = vsel %vm520_vm15, 0.0, %v519_v17 }
 0x1d0   :  { %v522_v62 = vsub.f32 %v512_v56, %v521_v59 }
 0x1d2   :  { %v523_v53 = vmul.f32 1.442695, %v522_v62 }
 0x1d4   :  { %1455 = vpow2.f32 %v523_v53 }
 0x1da   :  { %v1456_v54 = vpop.eup %1455 }
 0x1db   :  { %v525_v52 = vsel %vm1952_vm13, %v1456_v54, 0.0  ;;  %v2154_v54 = vld [vmem:[#allocation26_spill] sm:$0xff] }
 0x1dc   :  { %1385 = vmatmul.msk.f32.vlgmr.msrb.gmra.mxu1 %vm529_vm1, %v525_v52  ;;  %v526_v60 = vsel %vm516_vm14, %v525_v52, 0.0 }
 0x1dd   :  { %527 = vadd.xlane.f32.xlu0 %v526_v60  ;;  %768 = vmatpush.msrb.mxu1 %v1763_v19 }
 0x1df   :  { %769 = vmatpush.msrb.mxu1 %v1777_v23 }
 0x1e1   :  { %770 = vmatpush.msrb.mxu1 %v1789_v27 }
 0x1e3   :  { %771 = vmatpush.msrb.mxu1 %v1801_v31 }
 0x250   :  { %v528_v61 = vpop.xlane.xlu0 %527 }
 0x251   :  { %vm553_vm2 = vcmp.gt.f32.partialorder %v528_v61, 0.0 }
 0x252   :  { %v554_v30 = vsel %vm553_vm2, %v528_v61, 1.0 }
 0x253   :  { %1457 = vrcp.f32 %v554_v30  ;;  %v566_v9 = vand.u32 2147483648, %v554_v30  ;;  %v564_v5 = vand.u32 2147483647, %v554_v30  ;;  %vm560_vm4 = vweird.f32 %v554_v30 }
 0x255   :  { %v567_v25 = vor.u32 1.1754944e-38, %v566_v9  ;;  %vm565_vm6 = vcmp.eq.f32.partialorder %v564_v5, 8.507059e+37 }
 0x259   :  { %v1458_v33 = vpop.eup %1457  ;;  %v550_v56 = vpop.f32.mrf.mxu1 }
 0x25a   :  { %v556_v63 = vmul.f32 %v1458_v33, %v554_v30  ;;  %vm561_vm3 = vweird.f32 %v1458_v33 }
 0x25b   :  { %vm562_vm5 = vmor %vm560_vm4, %vm561_vm3 }
 0x25c   :  { %v557_v29 = vsub.f32 1.0, %v556_v63 }
 0x25e   :  { %v558_v13 = vmul.f32 %v1458_v33, %v557_v29 }
 0x260   :  { %v559_v22 = vadd.f32 %v1458_v33, %v558_v13 }
 0x262   :  { %v563_v26 = vsel %vm562_vm5, %v1458_v33, %v559_v22  ;;  %v2155_v22 = vld [vmem:[#allocation27_spill] sm:$0xff] }
 0x263   :  { %v568_v57 = vsel %vm565_vm6, %v567_v25, %v563_v26  ;;  %v2156_v26 = vld [vmem:[#allocation28_spill] sm:$0xff] }
 0x264   :  { %v570_v58 = vmul.f32 %v568_v57, %v550_v56 }
 0x266   :  { %1386 = vmatmul.msk.f32.vlgmr.msrb.gmra.mxu2 %vm159_vm0, %v570_v58  ;;  %1390 = vmatmul.msk.f32.vlgmr.msra.gmra.mxu1 %vm159_vm0, %v570_v58 }
 0x267   :  { %1394 = vmatmul.msk.f32.vlgmr.msrb.gmra.mxu0 %vm159_vm0, %v570_v58  ;;  %1397 = vmatmul.msk.f32.vlgmr.msrb.gmra.mxu3 %vm159_vm0, %v570_v58 }
 0x268   :  { %788 = vmatpush.msrb.mxu2 %v1813_v34  ;;  %851 = vmatpush.msra.mxu1 %v1819_v36 }
 0x269   :  { %1058 = vmatpush.msrb.mxu3 %v1715_v2  ;;  %977 = vmatpush.msrb.mxu0 %v1711_v0  ;;  %v2144_v0 = vld [vmem:[#allocation16_spill] sm:$0xff] }
 0x26a   :  { %789 = vmatpush.msrb.mxu2 %v1823_v37  ;;  %852 = vmatpush.msra.mxu1 %v1831_v40  ;;  %v2145_v2 = vld [vmem:[#allocation20_spill] sm:$0xff] }
 0x26b   :  { %1059 = vmatpush.msrb.mxu3 %v1727_v6  ;;  %978 = vmatpush.msrb.mxu0 %v1719_v3  ;;  %v2146_v3 = vld [vmem:[#allocation21_spill] sm:$0xff]  ;;  %v2148_v6 = vld [vmem:[#allocation22_spill] sm:$0xff] }
 0x26c   :  { %790 = vmatpush.msrb.mxu2 %v1835_v41  ;;  %853 = vmatpush.msra.mxu1 %v1843_v44 }
 0x26d   :  { %1060 = vmatpush.msrb.mxu3 %v1737_v10  ;;  %979 = vmatpush.msrb.mxu0 %v1729_v7  ;;  %v2149_v7 = vld [vmem:[#allocation23_spill] sm:$0xff]  ;;  %v2151_v10 = vld [vmem:[#allocation24_spill] sm:$0xff] }
 0x26e   :  { %1391 = vmatmul.msk.f32.vlgmr.msra.gmra.mxu2 %vm159_vm0, %v1928_v50  ;;  %1395 = vmatmul.msk.f32.vlgmr.msrb.gmra.mxu1 %vm159_vm0, %v1928_v50 }
 0x26f   :  { %1398 = vmatmul.msk.f32.vlgmr.msra.gmra.mxu0 %vm159_vm0, %v1928_v50  ;;  %791 = vmatpush.msrb.mxu2 %v1847_v45 }
 0x270   :  { %854 = vmatpush.msra.mxu1 %v1851_v46  ;;  %1061 = vmatpush.msrb.mxu3 %v1749_v14  ;;  %v631_v14 = vpop.f32.mrf.mxu0 }
 0x271   :  { %1401 = vmatpush.xpose.msk.msra.mxu2 %vm159_vm0, %v1895_v55  ;;  %980 = vmatpush.msrb.mxu0 %v1741_v11  ;;  %v2152_v11 = vld [vmem:[#allocation19_spill] sm:$0xff] }
 0x272   :  { %997 = vmatpush.msrb.mxu1 %v1721_v4  ;;  %v2147_v4 = vld [vmem:[#allocation17_spill] sm:$0xff] }
 0x273   :  { %1078 = vmatpush.msra.mxu0 %v1761_v18 }
 0x274   :  { %998 = vmatpush.msrb.mxu1 %v1731_v8  ;;  %v2150_v8 = vld [vmem:[#allocation18_spill] sm:$0xff] }
 0x275   :  { %1402 = vmatpush.xpose.msk.msra.mxu2 %vm159_vm0, %v1905_v51  ;;  %1079 = vmatpush.msra.mxu0 %v1771_v21 }
 0x276   :  { %999 = vmatpush.msrb.mxu1 %v1743_v12  ;;  %1396 = vmatmul.msk.f32.vlgmr.msrb.gmra.mxu2 %vm159_vm0, %v1928_v50  ;;  %v2153_v12 = vld [vmem:[#allocation25_spill] sm:$0xff] }
 0x277   :  { %1399 = vmatmul.msk.f32.vlgmr.msra.gmra.mxu1 %vm159_vm0, %v1928_v50  ;;  %1080 = vmatpush.msra.mxu0 %v2146_v3 }
 0x278   :  { %1000 = vmatpush.msrb.mxu1 %v1757_v16  ;;  %v611_v16 = vpop.f32.mrf.mxu3 }
 0x279   :  { %1017 = vmatpush.msrb.mxu2 %v2144_v0  ;;  %1081 = vmatpush.msra.mxu0 %v2149_v7 }
 0x27a   :  { %1098 = vmatpush.msra.mxu1 %v2145_v2 }
 0x27b   :  { %1018 = vmatpush.msrb.mxu2 %v2147_v4 }
 0x27c   :  { %1099 = vmatpush.msra.mxu1 %v2148_v6 }
 0x27d   :  { %1019 = vmatpush.msrb.mxu2 %v2150_v8 }
 0x27e   :  { %1100 = vmatpush.msra.mxu1 %v2151_v10 }
 0x27f   :  { %1020 = vmatpush.msrb.mxu2 %v2152_v11 }
 0x280   :  { %1101 = vmatpush.msra.mxu1 %v2153_v12  ;;  %v712_v50 = vpop.f32.mrf.mxu3 }
 0x2e3   :  { %v672_v18 = vpop.f32.mrf.mxu1 }
 0x2e4   :  { %v753_v21 = vpop.f32.mrf.mxu0 }
 0x2e9   :  { %v591_v17 = vpop.f32.mrf.mxu2 }
 0x2ea   :  { %v612_v59 = vadd.f32 %v611_v16, %v591_v17  ;;  %v816_v30 = vpop.f32.mrf.mxu3  ;;  %v2157_v17 = vld [vmem:[#allocation29_spill] sm:$0xff] }
 0x2eb   :  { %v773_v62 = vpop.f32.mrf.mxu1 }
 0x2ec   :  { %v634_v53 = vadd.f32 %v631_v14, %v612_v59  ;;  %v836_v60 = vpop.f32.mrf.mxu0  ;;  %v774_v11 = vadd.f32 %v773_v62, %v753_v21 }
 0x2ed   :  { %v837_v63 = vadd.f32 %v836_v60, %v816_v30 }
 0x2ee   :  { %v635_v52 = vadd.f32 %v2154_v54, %v634_v53 }
 0x2f0   :  { %v1389_v61 = vmul.f32 -1.442695, %v635_v52 }
 0x2f1   :  { %v692_v33 = vpop.f32.mrf.mxu2 }
 0x2f2   :  { %1459 = vpow2.f32 %v1389_v61  ;;  %v693_v29 = vadd.f32 %v692_v33, %v672_v18 }
 0x2f4   :  { %v856_v9 = vpop.f32.mrf.mxu1  ;;  %v715_v13 = vadd.f32 %v712_v50, %v693_v29 }
 0x2f5   :  { %v859_v5 = vadd.f32 %v856_v9, %v837_v63 }
 0x2f6   :  { %v716_v25 = vadd.f32 %v2155_v22, %v715_v13 }
 0x2f7   :  { %v860_v56 = vadd.f32 %v2156_v26, %v859_v5 }
 0x2f8   :  { %v1460_v57 = vpop.eup %1459  ;;  %v1393_v58 = vmul.f32 -1.442695, %v716_v25 }
 0x2f9   :  { %v1400_v0 = vmul.f32 -1.442695, %v860_v56  ;;  %v639_v2 = vadd.f32 1.0, %v1460_v57  ;;  %v793_v10 = vpop.f32.mrf.mxu2 }
 0x2fa   :  { %1461 = vpow2.f32 %v1393_v58  ;;  %v796_v16 = vadd.f32 %v793_v10, %v774_v11 }
 0x2fb   :  { %1463 = vrcp.f32 %v639_v2  ;;  %v651_v61 = vand.u32 2147483648, %v639_v2  ;;  %vm645_vm8 = vweird.f32 %v639_v2  ;;  %v649_v63 = vand.u32 2147483647, %v639_v2 }
 0x2fc   :  { %1465 = vpow2.f32 %v1400_v0  ;;  %v797_v59 = vadd.f32 %v2157_v17, %v796_v16 }
 0x2fd   :  { %v652_v5 = vor.u32 1.1754944e-38, %v651_v61  ;;  %vm650_vm12 = vcmp.eq.f32.partialorder %v649_v63, 8.507059e+37 }
 0x300   :  { %v1462_v3 = vpop.eup %1461 }
 0x301   :  { %v1464_v4 = vpop.eup %1463  ;;  %v720_v6 = vadd.f32 1.0, %v1462_v3 }
 0x302   :  { %v1466_v7 = vpop.eup %1465  ;;  %v641_v8 = vmul.f32 %v1464_v4, %v639_v2  ;;  %vm646_vm7 = vweird.f32 %v1464_v4 }
 0x303   :  { %1467 = vrcp.f32 %v720_v6  ;;  %v864_v12 = vadd.f32 1.0, %v1466_v7  ;;  %v732_v29 = vand.u32 2147483648, %v720_v6  ;;  %vm647_vm9 = vmor %vm645_vm8, %vm646_vm7  ;;  %v730_v9 = vand.u32 2147483647, %v720_v6 }
 0x304   :  { %v642_v14 = vsub.f32 1.0, %v641_v8  ;;  %vm726_vm11 = vweird.f32 %v720_v6 }
 0x305   :  { %1469 = vrcp.f32 %v864_v12  ;;  %v733_v57 = vor.u32 1.1754944e-38, %v732_v29  ;;  %vm731_vm2 = vcmp.eq.f32.partialorder %v730_v9, 8.507059e+37  ;;  %v876_v11 = vand.u32 2147483648, %v864_v12 }
 0x306   :  { %v643_v18 = vmul.f32 %v1464_v4, %v642_v14  ;;  %1471 = vtanh.f32 %v797_v59  ;;  %vm870_vm4 = vweird.f32 %v864_v12 }
 0x307   :  { %v877_v16 = vor.u32 1.1754944e-38, %v876_v11 }
 0x308   :  { %v644_v52 = vadd.f32 %v1464_v4, %v643_v18 }
 0x309   :  { %v1468_v50 = vpop.eup %1467 }
 0x30a   :  { %v722_v53 = vmul.f32 %v1468_v50, %v720_v6  ;;  %v648_v62 = vsel %vm647_vm9, %v1464_v4, %v644_v52  ;;  %vm727_vm10 = vweird.f32 %v1468_v50  ;;  %v874_v6 = vand.u32 2147483647, %v864_v12 }
 0x30b   :  { %v1470_v60 = vpop.eup %1469  ;;  %v653_v56 = vsel %vm650_vm12, %v652_v5, %v648_v62  ;;  %vm728_vm15 = vmor %vm726_vm11, %vm727_vm10 }
 0x30c   :  { %v723_v30 = vsub.f32 1.0, %v722_v53  ;;  %v866_v33 = vmul.f32 %v1470_v60, %v864_v12  ;;  %v1472_v0 = vpop.eup %1471  ;;  %vm871_vm3 = vweird.f32 %v1470_v60  ;;  %vm875_vm6 = vcmp.eq.f32.partialorder %v874_v6, 8.507059e+37 }
 0x30d   :  { %v881_v8 = vmul.f32 %v1472_v0, %v653_v56  ;;  %vm872_vm5 = vmor %vm870_vm4, %vm871_vm3 }
 0x30e   :  { %v724_v21 = vmul.f32 %v1468_v50, %v723_v30  ;;  %v867_v13 = vsub.f32 1.0, %v866_v33 }
 0x310   :  { %v725_v25 = vadd.f32 %v1468_v50, %v724_v21  ;;  %v868_v3 = vmul.f32 %v1470_v60, %v867_v13 }
 0x312   :  { %v729_v58 = vsel %vm728_vm15, %v1468_v50, %v725_v25  ;;  %v869_v4 = vadd.f32 %v1470_v60, %v868_v3 }
 0x313   :  { %v734_v2 = vsel %vm731_vm2, %v733_v57, %v729_v58 }
 0x314   :  { %v880_v7 = vmul.f32 %v734_v2, %v1925_v1  ;;  %v873_v14 = vsel %vm872_vm5, %v1470_v60, %v869_v4 }
 0x315   :  { %v878_v50 = vsel %vm875_vm6, %v877_v16, %v873_v14 }
 0x316   :  { %v2022_v10 = vadd.f32 %v881_v8, %v880_v7 }
 0x318   :  { %1473 = vtanh.f32 %v2022_v10 }
 0x31e   :  { %v1474_v18 = vpop.eup %1473 }
 0x31f   :  { %v2025_v59 = vmul.f32 %v1474_v18, %v878_v50 }
 0x321   :  { %1403 = vmatmul.msk.f32.vlgmr.msra.gmra.mxu2 %vm159_vm0, %v2025_v59  ;;  %1406 = vmatmul.msk.f32.vlgmr.msrb.gmra.mxu1 %vm159_vm0, %v2025_v59 }
 0x322   :  { %1139 = vmatpush.msra.mxu2 %v1755_v15  ;;  %1202 = vmatpush.msrb.mxu1 %v1825_v38 }
 0x324   :  { %1140 = vmatpush.msra.mxu2 %v1767_v20  ;;  %1203 = vmatpush.msrb.mxu1 %v1837_v42 }
 0x326   :  { %1141 = vmatpush.msra.mxu2 %v1779_v24  ;;  %1204 = vmatpush.msrb.mxu1 %v1855_v47 }
 0x328   :  { %1142 = vmatpush.msra.mxu2 %v1791_v28  ;;  %1205 = vmatpush.msrb.mxu1 %v1861_v48 }
 0x329   :  { %1407 = vmatmul.msk.f32.vlgmr.msrb.gmra.mxu2 %vm159_vm0, %v2025_v59  ;;  %1411 = vmatmul.msk.f32.vlgmr.msra.gmra.mxu1 %vm159_vm0, %v2025_v59 }
 0x32a   :  { %1222 = vmatpush.msrb.mxu2 %v1803_v32  ;;  %1329 = vmatpush.msra.mxu1 %v1895_v55 }
 0x32c   :  { %1223 = vmatpush.msrb.mxu2 %v1817_v35  ;;  %1330 = vmatpush.msra.mxu1 %v1905_v51 }
 0x32e   :  { %1224 = vmatpush.msrb.mxu2 %v1829_v39 }
 0x330   :  { %1225 = vmatpush.msrb.mxu2 %v1841_v43 }
 0x3a4   :  { %v905_v1 = vpop.f32.mrf.mxu2 }
 0x3a5   :  { %v908_v15 = vsel %vm1952_vm13, %v905_v1, -inf }
 0x3a6   :  { %v909_v20 = vsel %vm516_vm14, %v908_v15, -inf }
 0x3a7   :  { %910 = vmax.xlane.f32.xlu1 %v909_v20 }
 0x41a   :  { %v911_v24 = vpop.xlane.xlu1 %910 }
 0x41b   :  { %vm912_vm7 = vcmp.eq.f32.partialorder %v911_v24, -inf }
 0x41c   :  { %v913_v28 = vsel %vm912_vm7, 0.0, %v911_v24 }
 0x41d   :  { %v914_v32 = vsub.f32 %v905_v1, %v913_v28 }
 0x41f   :  { %v915_v38 = vmul.f32 1.442695, %v914_v32 }
 0x421   :  { %1475 = vpow2.f32 %v915_v38 }
 0x427   :  { %v1476_v35 = vpop.eup %1475 }
 0x428   :  { %v917_v42 = vsel %vm1952_vm13, %v1476_v35, 0.0 }
 0x429   :  { %1404 = vmatmul.msk.f32.vlgmr.msra.gmra.mxu3 %vm529_vm1, %v917_v42  ;;  %v918_v39 = vsel %vm516_vm14, %v917_v42, 0.0 }
 0x42a   :  { %919 = vadd.xlane.f32.xlu1 %v918_v39  ;;  %1159 = vmatpush.msra.mxu3 %v1763_v19 }
 0x42c   :  { %1160 = vmatpush.msra.mxu3 %v1777_v23 }
 0x42e   :  { %1161 = vmatpush.msra.mxu3 %v1789_v27 }
 0x430   :  { %1162 = vmatpush.msra.mxu3 %v1801_v31 }
 0x49d   :  { %v920_v43 = vpop.xlane.xlu1 %919 }
 0x49e   :  { %vm944_vm8 = vcmp.gt.f32.partialorder %v920_v43, 0.0 }
 0x49f   :  { %v945_v47 = vsel %vm944_vm8, %v920_v43, 1.0 }
 0x4a0   :  { %1477 = vrcp.f32 %v945_v47  ;;  %v957_v52 = vand.u32 2147483648, %v945_v47  ;;  %v955_v61 = vand.u32 2147483647, %v945_v47  ;;  %vm951_vm10 = vweird.f32 %v945_v47 }
 0x4a2   :  { %v958_v19 = vor.u32 1.1754944e-38, %v957_v52  ;;  %vm956_vm12 = vcmp.eq.f32.partialorder %v955_v61, 8.507059e+37 }
 0x4a6   :  { %v1478_v48 = vpop.eup %1477 }
 0x4a7   :  { %v947_v12 = vmul.f32 %v1478_v48, %v945_v47  ;;  %vm952_vm9 = vweird.f32 %v1478_v48 }
 0x4a8   :  { %vm953_vm11 = vmor %vm951_vm10, %vm952_vm9 }
 0x4a9   :  { %v948_v53 = vsub.f32 1.0, %v947_v12 }
 0x4ab   :  { %v949_v60 = vmul.f32 %v1478_v48, %v948_v53 }
 0x4ac   :  { %v941_v27 = vpop.f32.mrf.mxu3 }
 0x4ad   :  { %v950_v30 = vadd.f32 %v1478_v48, %v949_v60 }
 0x4af   :  { %v954_v23 = vsel %vm953_vm11, %v1478_v48, %v950_v30 }
 0x4b0   :  { %v959_v33 = vsel %vm956_vm12, %v958_v19, %v954_v23 }
 0x4b1   :  { %v961_v31 = vmul.f32 %v959_v33, %v941_v27 }
 0x4b3   :  { %1405 = vmatmul.msk.f32.vlgmr.msrb.gmra.mxu0 %vm159_vm0, %v961_v31  ;;  %1409 = vmatmul.msk.f32.vlgmr.msrb.gmra.mxu3 %vm159_vm0, %v961_v31 }
 0x4b4   :  { %1413 = vmatmul.msk.f32.vlgmr.msra.gmra.mxu2 %vm159_vm0, %v961_v31  ;;  %1416 = vmatmul.msk.f32.vlgmr.msrb.gmra.mxu1 %vm159_vm0, %v961_v31 }
 0x4b5   :  { %1242 = vmatpush.msrb.mxu3 %v1819_v36  ;;  %1179 = vmatpush.msrb.mxu0 %v1813_v34  ;;  %v1002_v34 = vpop.f32.mrf.mxu1  ;;  %v1022_v36 = vpop.f32.mrf.mxu2 }
 0x4b7   :  { %1243 = vmatpush.msrb.mxu3 %v1831_v40  ;;  %1180 = vmatpush.msrb.mxu0 %v1823_v37 }
 0x4b9   :  { %1244 = vmatpush.msrb.mxu3 %v1843_v44  ;;  %1181 = vmatpush.msrb.mxu0 %v1835_v41 }
 0x4bb   :  { %1410 = vmatmul.msk.f32.vlgmr.msra.gmra.mxu0 %vm159_vm0, %v2025_v59  ;;  %1414 = vmatmul.msk.f32.vlgmr.msra.gmra.mxu3 %vm159_vm0, %v2025_v59 }
 0x4bc   :  { %1417 = vmatmul.msk.f32.vlgmr.msrb.gmra.mxu2 %vm159_vm0, %v2025_v59  ;;  %1245 = vmatpush.msrb.mxu3 %v1851_v46 }
 0x4bd   :  { %1182 = vmatpush.msrb.mxu0 %v1847_v45 }
 0x4bf   :  { %1420 = vmatpush.xpose.msk.msra.mxu0 %vm159_vm0, %v1895_v55 }
 0x4c3   :  { %1421 = vmatpush.xpose.msk.msra.mxu0 %vm159_vm0, %v1905_v51  ;;  %1418 = vmatmul.msk.f32.vlgmr.msrb.gmra.mxu3 %vm159_vm0, %v2025_v59  ;;  %v1103_v51 = vpop.f32.mrf.mxu1 }
 0x4c4   :  { %1415 = vmatmul.msk.f32.vlgmr.msrb.gmra.mxu0 %vm159_vm0, %v2025_v59 }
 0x530   :  { %v982_v37 = vpop.f32.mrf.mxu0 }
 0x531   :  { %v1003_v40 = vadd.f32 %v1002_v34, %v982_v37  ;;  %v1207_v57 = vpop.f32.mrf.mxu1 }
 0x533   :  { %v1025_v41 = vadd.f32 %v1022_v36, %v1003_v40 }
 0x535   :  { %v1026_v44 = vadd.f32 %v2154_v54, %v1025_v41 }
 0x536   :  { %v1063_v45 = vpop.f32.mrf.mxu3 }
 0x537   :  { %v1408_v46 = vmul.f32 -1.442695, %v1026_v44  ;;  %v1144_v63 = vpop.f32.mrf.mxu2 }
 0x538   :  { %v1083_v55 = vpop.f32.mrf.mxu0 }
 0x539   :  { %1479 = vpow2.f32 %v1408_v46  ;;  %v1084_v29 = vadd.f32 %v1083_v55, %v1063_v45 }
 0x53b   :  { %v1106_v21 = vadd.f32 %v1103_v51, %v1084_v29 }
 0x53d   :  { %v1107_v62 = vadd.f32 %v2155_v22, %v1106_v21 }
 0x53e   :  { %v1164_v9 = vpop.f32.mrf.mxu3 }
 0x53f   :  { %v1480_v13 = vpop.eup %1479  ;;  %v1412_v5 = vmul.f32 -1.442695, %v1107_v62  ;;  %v1227_v56 = vpop.f32.mrf.mxu2  ;;  %v1165_v8 = vadd.f32 %v1164_v9, %v1144_v63 }
 0x540   :  { %v1030_v25 = vadd.f32 1.0, %v1480_v13  ;;  %v1228_v58 = vadd.f32 %v1227_v56, %v1207_v57 }
 0x541   :  { %1481 = vpow2.f32 %v1412_v5  ;;  %v1184_v11 = vpop.f32.mrf.mxu0 }
 0x542   :  { %1483 = vrcp.f32 %v1030_v25  ;;  %v1187_v16 = vadd.f32 %v1184_v11, %v1165_v8  ;;  %v1042_v20 = vand.u32 2147483648, %v1030_v25  ;;  %vm1036_vm2 = vweird.f32 %v1030_v25 }
 0x543   :  { %v1040_v32 = vand.u32 2147483647, %v1030_v25 }
 0x544   :  { %v1188_v59 = vadd.f32 %v2157_v17, %v1187_v16  ;;  %v1043_v43 = vor.u32 1.1754944e-38, %v1042_v20 }
 0x545   :  { %vm1041_vm6 = vcmp.eq.f32.partialorder %v1040_v32, 8.507059e+37 }
 0x546   :  { %v1247_v54 = vpop.f32.mrf.mxu3 }
 0x547   :  { %v1482_v0 = vpop.eup %1481  ;;  %v1250_v3 = vadd.f32 %v1247_v54, %v1228_v58 }
 0x548   :  { %v1484_v2 = vpop.eup %1483  ;;  %v1111_v7 = vadd.f32 1.0, %v1482_v0 }
 0x549   :  { %v1032_v4 = vmul.f32 %v1484_v2, %v1030_v25  ;;  %v1251_v6 = vadd.f32 %v2156_v26, %v1250_v3  ;;  %vm1037_vm15 = vweird.f32 %v1484_v2 }
 0x54a   :  { %1485 = vrcp.f32 %v1111_v7  ;;  %v1123_v38 = vand.u32 2147483648, %v1111_v7  ;;  %vm1038_vm3 = vmor %vm1036_vm2, %vm1037_vm15  ;;  %v1121_v39 = vand.u32 2147483647, %v1111_v7  ;;  %vm1117_vm5 = vweird.f32 %v1111_v7 }
 0x54b   :  { %v1033_v22 = vsub.f32 1.0, %v1032_v4  ;;  %v1419_v14 = vmul.f32 -1.442695, %v1251_v6 }
 0x54c   :  { %v1124_v48 = vor.u32 1.1754944e-38, %v1123_v38  ;;  %vm1122_vm8 = vcmp.eq.f32.partialorder %v1121_v39, 8.507059e+37 }
 0x54d   :  { %v1034_v18 = vmul.f32 %v1484_v2, %v1033_v22  ;;  %1487 = vpow2.f32 %v1419_v14 }
 0x54e   :  { %1489 = vtanh.f32 %v1188_v59 }
 0x54f   :  { %v1035_v15 = vadd.f32 %v1484_v2, %v1034_v18 }
 0x550   :  { %v1486_v50 = vpop.eup %1485 }
 0x551   :  { %v1113_v1 = vmul.f32 %v1486_v50, %v1111_v7  ;;  %v1039_v42 = vsel %vm1038_vm3, %v1484_v2, %v1035_v15  ;;  %vm1118_vm4 = vweird.f32 %v1486_v50 }
 0x552   :  { %v1044_v47 = vsel %vm1041_vm6, %v1043_v43, %v1039_v42  ;;  %vm1119_vm7 = vmor %vm1117_vm5, %vm1118_vm4 }
 0x553   :  { %v1488_v24 = vpop.eup %1487  ;;  %v1114_v28 = vsub.f32 1.0, %v1113_v1 }
 0x554   :  { %v1255_v26 = vadd.f32 1.0, %v1488_v24  ;;  %v1490_v53 = vpop.eup %1489 }
 0x555   :  { %v1115_v35 = vmul.f32 %v1486_v50, %v1114_v28  ;;  %v1272_v61 = vmul.f32 %v1490_v53, %v1044_v47 }
 0x556   :  { %1491 = vrcp.f32 %v1255_v26  ;;  %v1267_v33 = vand.u32 2147483648, %v1255_v26  ;;  %v1265_v34 = vand.u32 2147483647, %v1255_v26  ;;  %vm1261_vm10 = vweird.f32 %v1255_v26 }
 0x557   :  { %v1116_v17 = vadd.f32 %v1486_v50, %v1115_v35 }
 0x558   :  { %v1268_v37 = vor.u32 1.1754944e-38, %v1267_v33  ;;  %vm1266_vm12 = vcmp.eq.f32.partialorder %v1265_v34, 8.507059e+37 }
 0x559   :  { %v1120_v12 = vsel %vm1119_vm7, %v1486_v50, %v1116_v17 }
 0x55a   :  { %v1125_v52 = vsel %vm1122_vm8, %v1124_v48, %v1120_v12 }
 0x55b   :  { %v1271_v60 = vmul.f32 %v1125_v52, %v2022_v10 }
 0x55c   :  { %v1492_v30 = vpop.eup %1491 }
 0x55d   :  { %v1273_v19 = vadd.f32 %v1272_v61, %v1271_v60  ;;  %v1257_v23 = vmul.f32 %v1492_v30, %v1255_v26  ;;  %vm1262_vm9 = vweird.f32 %v1492_v30 }
 0x55e   :  { %vm1263_vm11 = vmor %vm1261_vm10, %vm1262_vm9 }
 0x55f   :  { %1493 = vtanh.f32 %v1273_v19  ;;  %v1258_v27 = vsub.f32 1.0, %v1257_v23 }
 0x561   :  { %v1259_v31 = vmul.f32 %v1492_v30, %v1258_v27 }
 0x563   :  { %v1260_v36 = vadd.f32 %v1492_v30, %v1259_v31 }
 0x565   :  { %v1494_v40 = vpop.eup %1493  ;;  %v1264_v41 = vsel %vm1263_vm11, %v1492_v30, %v1260_v36 }
 0x566   :  { %v1269_v44 = vsel %vm1266_vm12, %v1268_v37, %v1264_v41 }
 0x567   :  { %v1275_v45 = vmul.f32 %v1494_v40, %v1269_v44 }
 0x569   :  { %1422 = vmatmul.msk.f32.vlgmr.msra.gmra.mxu0 %vm159_vm0, %v1275_v45 }
 0x5e6   :  { %v1296_v10 = vpop.f32.mrf.mxu0 }
 0x5e7   :  { %v1299_v46 = vsel %vm1952_vm13, %v1296_v10, -inf }
 0x5e8   :  { %v1300_v63 = vsel %vm516_vm14, %v1299_v46, -inf }
 0x5e9   :  { %1301 = vmax.xlane.f32.xlu2 %v1300_v63 }
 0x65c   :  { %v1302_v55 = vpop.xlane.xlu2 %1301 }
 0x65d   :  { %vm1303_vm15 = vcmp.eq.f32.partialorder %v1302_v55, -inf }
 0x65e   :  { %v1304_v29 = vsel %vm1303_vm15, 0.0, %v1302_v55 }
 0x65f   :  { %v1305_v51 = vsub.f32 %v1296_v10, %v1304_v29 }
 0x661   :  { %v1306_v21 = vmul.f32 1.442695, %v1305_v51 }
 0x663   :  { %1495 = vpow2.f32 %v1306_v21 }
 0x669   :  { %v1496_v62 = vpop.eup %1495 }
 0x66a   :  { %v1308_v9 = vsel %vm1952_vm13, %v1496_v62, 0.0 }
 0x66b   :  { %1423 = vmatmul.msk.f32.vlgmr.msra.gmra.mxu1 %vm529_vm1, %v1308_v9  ;;  %v1309_v13 = vsel %vm516_vm14, %v1308_v9, 0.0  ;;  %vm1358_vm14 = vcmask 517120  }
 0x66c   :  { %1310 = vadd.xlane.f32.xlu2 %v1309_v13 }
 0x6df   :  { %v1311_v5 = vpop.xlane.xlu2 %1310 }
 0x6e0   :  { %vm1335_vm2 = vcmp.gt.f32.partialorder %v1311_v5, 0.0 }
 0x6e1   :  { %v1336_v25 = vsel %vm1335_vm2, %v1311_v5, 1.0 }
 0x6e2   :  { %1497 = vrcp.f32 %v1336_v25  ;;  %v1348_v54 = vand.u32 2147483648, %v1336_v25  ;;  %v1346_v3 = vand.u32 2147483647, %v1336_v25  ;;  %vm1342_vm4 = vweird.f32 %v1336_v25 }
 0x6e4   :  { %v1349_v49 = vor.u32 1.1754944e-38, %v1348_v54  ;;  %vm1347_vm13 = vcmp.eq.f32.partialorder %v1346_v3, 8.507059e+37 }
 0x6e8   :  { %v1498_v56 = vpop.eup %1497  ;;  %v1332_v8 = vpop.f32.mrf.mxu1 }
 0x6e9   :  { %v1338_v57 = vmul.f32 %v1498_v56, %v1336_v25  ;;  %vm1343_vm3 = vweird.f32 %v1498_v56 }
 0x6ea   :  { %vm1344_vm5 = vmor %vm1342_vm4, %vm1343_vm3 }
 0x6eb   :  { %v1339_v58 = vsub.f32 1.0, %v1338_v57 }
 0x6ed   :  { %v1340_v0 = vmul.f32 %v1498_v56, %v1339_v58 }
 0x6ef   :  { %v1341_v2 = vadd.f32 %v1498_v56, %v1340_v0 }
 0x6f1   :  { %v1345_v7 = vsel %vm1344_vm5, %v1498_v56, %v1341_v2 }
 0x6f2   :  { %v1350_v4 = vsel %vm1347_vm13, %v1349_v49, %v1345_v7 }
 0x6f3   :  { %v1352_v11 = vmul.f32 %v1350_v4, %v1332_v8 }
 0x6f5   :  { %1354 = vrot.lane.b32.xlu0 %v1352_v11, %s1659_s5 }
 0x767   :  { %v1355_v6 = vpop.permute.xlu0 %1354 }
 0x768   :  { %v1357_v22 = vsel %vm159_vm0, %v1275_v45, %v1355_v6 }
 0x769   :  { %1359 = vst.msk [vmem:[#allocation11] sm:$0x3] %vm1358_vm14, %v1357_v22 }
 0x76a   :  { %1370 = dma.vmem_to_hbm [thread:$0]  %s1366_s28, 32, %s1368_s7, [#allocation4]  }
 0x76b   :  { %1649 = dma.done.wait [#allocation4], 32  }
 0x76c   :  { %1650 = vsyncadd [#allocation4], 4294967264 }
 0x76d   :  { %1375 = vsyncpa [#allocation3], 1 }
 0x76e   :  { %1376 = vsyncpa [#allocation6], 1 }
 0x76f   :  { %1377 = vsyncpa [#allocation9], 1 }
 0x770   :  { %1378 = vsyncpa [#allocation4], 1 }

</bundles_post_ra>
